<compile_context>
chip_gen: v7x
topology: tpu7x:2x2x1
jax: 0.10.0
libtpu: 0.0.40
codegen_flags: <defaults>
</compile_context>

<pallas_src>
import jax
import jax.numpy as jnp
from jax.experimental import pallas as pl
from jax.experimental.pallas import tpu as pltpu


def _round_up(x, m):
    return ((x + m - 1) // m) * m


def decoder_prologue_kernel(
    enc_ref, x0_ref,
    whc_ref, bhc_ref,                       # fused init_h / init_c        (Hp, 2Hp) / (1, 2Hp)
    w0_ref, b0_ref,                         # LSTM layer 0 fwd+bwd fused   (Ep+2Hp, 8Hp) / (1, 8Hp)
    w1_ref, b1_ref,                         # LSTM layer 1 fwd only fused  (3Hp, 4Hp) / (1, 4Hp)
    wahid_ref, waenc_ref, ba_ref, v_ref,    # additive attention (split halves, lane-padded)
    wo_ref, bo_ref,                         # attention output proj fused  (2Hp, Hp) / (1, Hp)
    att_ref,                                # out: (Bp, Hp) bf16
):
    enc = enc_ref[...]                                      # (Bp, S, Hp) bf16
    Bp, S, Hp = enc.shape

    # ---- init_hidden: mean over seq + tanh(Linear); h0/c0 from one fused matmul ----
    mean_enc = jnp.sum(enc.astype(jnp.float32), axis=1) * (1.0 / S)          # (Bp, Hp)
    hc = jnp.tanh(jnp.dot(mean_enc.astype(jnp.bfloat16), whc_ref[...],
                          preferred_element_type=jnp.float32) + bhc_ref[...])  # (Bp, 2Hp)
    h0 = hc[:, :Hp]
    c0 = hc[:, Hp:]
    h0_b = h0.astype(jnp.bfloat16)

    def lstm_gates(g, off, c):
        # PyTorch gate order i, f, g, o — each gate block is Hp lanes wide (128-aligned slice).
        i = jax.nn.sigmoid(g[:, off + 0 * Hp: off + 1 * Hp])
        f = jax.nn.sigmoid(g[:, off + 1 * Hp: off + 2 * Hp])
        gg = jnp.tanh(g[:, off + 2 * Hp: off + 3 * Hp])
        o = jax.nn.sigmoid(g[:, off + 3 * Hp: off + 4 * Hp])
        return o * jnp.tanh(f * c + i * gg)

    # ---- LSTM layer 0: both directions, input + hidden weights, ONE MXU push ----
    xh0 = jnp.concatenate([x0_ref[...], h0_b], axis=1)                       # (Bp, Ep+2Hp)
    g0 = jnp.dot(xh0, w0_ref[...], preferred_element_type=jnp.float32) + b0_ref[...]
    h_l0f = lstm_gates(g0, 0, c0)                                            # (Bp, Hp)
    h_l0b = lstm_gates(g0, 4 * Hp, c0)                                       # (Bp, Hp)

    # ---- LSTM layer 1 (forward dir only; backward half never reaches the output) ----
    x1 = jnp.concatenate([h_l0f.astype(jnp.bfloat16),
                          h_l0b.astype(jnp.bfloat16), h0_b], axis=1)         # (Bp, 3Hp)
    g1 = jnp.dot(x1, w1_ref[...], preferred_element_type=jnp.float32) + b1_ref[...]
    hidden = lstm_gates(g1, 0, c0)                                           # == lstm_out[:, :H]
    hidden_b = hidden.astype(jnp.bfloat16)

    # ---- additive attention, fully batched ----
    enc2d = enc.reshape(Bp * S, Hp)                                          # lane-dense view
    enc_proj = jnp.dot(enc2d, waenc_ref[...],
                       preferred_element_type=jnp.float32).reshape(Bp, S, Hp)
    hid_proj = jnp.dot(hidden_b, wahid_ref[...],
                       preferred_element_type=jnp.float32) + ba_ref[...]     # (Bp, Hp)
    energy = jnp.tanh(hid_proj[:, None, :] + enc_proj)                       # (Bp, S, Hp)

    scores = jnp.sum(energy * v_ref[...][None], axis=-1)                     # (Bp, S)
    m = jnp.max(scores, axis=-1, keepdims=True)
    e = jnp.exp(scores - m)
    w = e * pl.reciprocal(jnp.sum(e, axis=-1, keepdims=True), approx=True)   # softmax over S

    # context on the MXU (batched contraction) instead of a VPU product + sublane reduce
    context = jnp.einsum("bqs,bsh->bqh",
                         w[:, None, :].astype(jnp.bfloat16), enc,
                         preferred_element_type=jnp.float32)[:, 0, :]        # (Bp, Hp)

    # attention output proj: cat(context, hidden) against one fused (2Hp, Hp) weight
    x_att = jnp.concatenate([context.astype(jnp.bfloat16), hidden_b], axis=1)
    att_out = jnp.tanh(jnp.dot(x_att, wo_ref[...],
                               preferred_element_type=jnp.float32) + bo_ref[...])
    att_ref[...] = att_out.astype(att_ref.dtype)


def vocab_proj_kernel(att_ref, wout_ref, bout_ref, out_ref):
    # One lane-dense (Bp, TN) tile of the vocab projection per grid step (wout streamed).
    out_ref[...] = (jnp.dot(att_ref[...], wout_ref[...],
                            preferred_element_type=jnp.float32) + bout_ref[...])


def init_params(key, vocab_size, embed_dim, hidden_dim):
    H, E, V = hidden_dim, embed_dim, vocab_size

    def u(k, shape):
        return jax.random.uniform(k, shape, jnp.float32, -0.1, 0.1)

    keys = iter(jax.random.split(key, 40))
    p = {
        "embedding": u(next(keys), (V, E)),
        "init_h_W": u(next(keys), (H, H)), "init_h_b": u(next(keys), (H,)),
        "init_c_W": u(next(keys), (H, H)), "init_c_b": u(next(keys), (H,)),
        "attn_W": u(next(keys), (H, 2 * H)), "attn_b": u(next(keys), (H,)),
        "attn_v": u(next(keys), (H,)),
        "attn_out_W": u(next(keys), (H, 2 * H)), "attn_out_b": u(next(keys), (H,)),
        "out_W": u(next(keys), (V, H)), "out_b": u(next(keys), (V,)),
    }
    for layer in (0, 1):
        in_size = E + H if layer == 0 else 2 * H
        for dname in ("f", "b"):
            p[f"lstm_l{layer}{dname}"] = (
                u(next(keys), (4 * H, in_size)),   # W_ih  (torch layout: (4H, in))
                u(next(keys), (4 * H, H)),         # W_hh
                u(next(keys), (4 * H,)),           # b_ih
                u(next(keys), (4 * H,)),           # b_hh
            )
    return p


def decoder_forward(encoder_outputs, params, max_len):
    B, S, H = encoder_outputs.shape
    E = params["embedding"].shape[1]
    V = params["out_W"].shape[0]

    Hp = _round_up(H, 128)            # lane-dense hidden
    Ep = _round_up(E, 128)            # lane-dense embed
    Bp = max(_round_up(B, 8), 8)      # full-sublane batch
    TN = 256                          # vocab tile: full v6e/v7x MXU N width
    Vp = _round_up(V, TN)

    f32, bf16 = jnp.float32, jnp.bfloat16
    T = jnp.transpose

    def pad2(x, rows, cols):
        return jnp.zeros((rows, cols), f32).at[:x.shape[0], :x.shape[1]].set(x)

    def padrow(b, cols):
        return jnp.zeros((1, cols), f32).at[0, :b.shape[0]].set(b)

    # fused init_h / init_c: one (Hp, 2Hp) matmul
    w_hc = jnp.zeros((Hp, 2 * Hp), f32)
    w_hc = w_hc.at[:H, :H].set(T(params["init_h_W"]))
    w_hc = w_hc.at[:H, Hp:Hp + H].set(T(params["init_c_W"]))
    b_hc = jnp.zeros((1, 2 * Hp), f32)
    b_hc = b_hc.at[0, :H].set(params["init_h_b"])
    b_hc = b_hc.at[0, Hp:Hp + H].set(params["init_c_b"])

    # LSTM layer 0: fwd+bwd directions and W_ih/W_hh fused into (Ep+2Hp, 8Hp).
    # Row blocks: [0:E]=embedded token, [Ep:Ep+H]=prev_attention, [Ep+Hp:Ep+Hp+H]=h0.
    w0 = jnp.zeros((Ep + 2 * Hp, 8 * Hp), f32)
    b0 = jnp.zeros((1, 8 * Hp), f32)
    for d, dname in enumerate(("f", "b")):
        w_ih, w_hh, b_ih, b_hh = params[f"lstm_l0{dname}"]
        w_ihT, w_hhT = T(w_ih), T(w_hh)            # (E+H, 4H), (H, 4H)
        bias = b_ih + b_hh
        for k in range(4):                         # torch gate order i, f, g, o
            col = d * 4 * Hp + k * Hp
            w0 = w0.at[:E, col:col + H].set(w_ihT[:E, k * H:(k + 1) * H])
            w0 = w0.at[Ep:Ep + H, col:col + H].set(w_ihT[E:, k * H:(k + 1) * H])
            w0 = w0.at[Ep + Hp:Ep + Hp + H, col:col + H].set(w_hhT[:, k * H:(k + 1) * H])
            b0 = b0.at[0, col:col + H].set(bias[k * H:(k + 1) * H])

    # LSTM layer 1 forward direction: (3Hp, 4Hp); row blocks = [h_l0f | h_l0b | h0].
    w_ih1, w_hh1, b_ih1, b_hh1 = params["lstm_l1f"]
    w_ih1T, w_hh1T = T(w_ih1), T(w_hh1)            # (2H, 4H), (H, 4H)
    bias1 = b_ih1 + b_hh1
    w1 = jnp.zeros((3 * Hp, 4 * Hp), f32)
    b1 = jnp.zeros((1, 4 * Hp), f32)
    for k in range(4):
        col = k * Hp
        w1 = w1.at[:H, col:col + H].set(w_ih1T[:H, k * H:(k + 1) * H])
        w1 = w1.at[Hp:Hp + H, col:col + H].set(w_ih1T[H:, k * H:(k + 1) * H])
        w1 = w1.at[2 * Hp:2 * Hp + H, col:col + H].set(w_hh1T[:, k * H:(k + 1) * H])
        b1 = b1.at[0, col:col + H].set(bias1[k * H:(k + 1) * H])

    # attention: split the (2H -> H) Linear into its hidden-half and encoder-half
    waT = T(params["attn_W"])                      # (2H, H); torch cat order = [hidden, encoder]
    wa_hid = pad2(waT[:H], Hp, Hp)
    wa_enc = pad2(waT[H:], Hp, Hp)
    ba = padrow(params["attn_b"], Hp)
    v = padrow(params["attn_v"], Hp)

    # attention output proj fused: row blocks = [context | hidden] (torch cat order)
    woT = T(params["attn_out_W"])                  # (2H, H)
    wo = jnp.zeros((2 * Hp, Hp), f32)
    wo = wo.at[:H, :H].set(woT[:H])
    wo = wo.at[Hp:Hp + H, :H].set(woT[H:])
    bo = padrow(params["attn_out_b"], Hp)

    # vocab projection, zero-padded to a lane-dense Vp (multiple of the 256-wide tile)
    wout = pad2(T(params["out_W"]), Hp, Vp)
    bout = padrow(params["out_b"], Vp)

    # inputs: batch padded to a full 8-sublane vreg, hidden/embed dims padded to 128 lanes
    enc = jnp.zeros((Bp, S, Hp), f32).at[:B, :, :H].set(encoder_outputs.astype(f32))
    # glue: embedding lookup of the zero start token + zero prev_attention (t=0)
    x0 = jnp.zeros((Bp, Ep + Hp), f32).at[:, :E].set(
        jnp.broadcast_to(params["embedding"][0], (Bp, E)))

    # bf16 on every MXU input; accumulation stays f32 via preferred_element_type
    enc, x0 = enc.astype(bf16), x0.astype(bf16)
    w_hc, w0, w1 = w_hc.astype(bf16), w0.astype(bf16), w1.astype(bf16)
    wa_hid, wa_enc = wa_hid.astype(bf16), wa_enc.astype(bf16)
    wo, wout = wo.astype(bf16), wout.astype(bf16)

    vmem_cap = 48 * 1024 * 1024   # well above v5e's 16 MiB scoped default, below v7x physical

    # --- call 1: LSTM + attention prologue (single block, everything resident) ---
    prologue_args = [enc, x0, w_hc, b_hc, w0, b0, w1, b1,
                     wa_hid, wa_enc, ba, v, wo, bo]
    att_out = pl.pallas_call(
        decoder_prologue_kernel,
        out_shape=jax.ShapeDtypeStruct((Bp, Hp), bf16),
        in_specs=[pl.BlockSpec(memory_space=pltpu.MemorySpace.VMEM)] * len(prologue_args),
        out_specs=pl.BlockSpec(memory_space=pltpu.MemorySpace.VMEM),
        compiler_params=pltpu.CompilerParams(vmem_limit_bytes=vmem_cap),
    )(*prologue_args)

    # --- call 2: vocab projection, wout streamed over 256-wide tiles on a parallel grid ---
    out_padded = pl.pallas_call(
        vocab_proj_kernel,
        out_shape=jax.ShapeDtypeStruct((Bp, Vp), jnp.float32),
        grid=(Vp // TN,),
        in_specs=[pl.BlockSpec((Bp, Hp), lambda j: (0, 0)),
                  pl.BlockSpec((Hp, TN), lambda j: (0, j)),
                  pl.BlockSpec((1, TN), lambda j: (0, j))],
        out_specs=pl.BlockSpec((Bp, TN), lambda j: (0, j)),
        compiler_params=pltpu.CompilerParams(
            dimension_semantics=("parallel",),
            vmem_limit_bytes=vmem_cap),
    )(att_out, wout, bout)

    out_t0 = out_padded[:B, :V]
    # torch returns inside the loop: only t=0 is filled, the rest stays zero.
    outputs = jnp.zeros((B, max_len, V), jnp.float32).at[:, 0, :].set(out_t0)
    return outputs


if __name__ == "__main__":
    B, S, H, E, V, MAX_LEN = 2, 8, 32, 16, 64, 4

    key = jax.random.PRNGKey(0)
    pkey, xkey = jax.random.split(key)
    params = init_params(pkey, V, E, H)
    encoder_outputs = jax.random.normal(xkey, (B, S, H), jnp.float32)

    out = decoder_forward(encoder_outputs, params, MAX_LEN)
    jax.block_until_ready(out)
    assert out.shape == (B, MAX_LEN, V)
    assert bool(jnp.all(jnp.isfinite(out)))
    print("KERNEL_OK")
</pallas_src>

<mosaic_0001>
module attributes {stable_mosaic.version = 11 : i64} {
  func.func @decoder_prologue_kernel(%arg0: memref<8x8x128xbf16, #tpu.memory_space<vmem>>, %arg1: memref<8x256xbf16, #tpu.memory_space<vmem>>, %arg2: memref<128x256xbf16, #tpu.memory_space<vmem>>, %arg3: memref<1x256xf32, #tpu.memory_space<vmem>>, %arg4: memref<384x1024xbf16, #tpu.memory_space<vmem>>, %arg5: memref<1x1024xf32, #tpu.memory_space<vmem>>, %arg6: memref<384x512xbf16, #tpu.memory_space<vmem>>, %arg7: memref<1x512xf32, #tpu.memory_space<vmem>>, %arg8: memref<128x128xbf16, #tpu.memory_space<vmem>>, %arg9: memref<128x128xbf16, #tpu.memory_space<vmem>>, %arg10: memref<1x128xf32, #tpu.memory_space<vmem>>, %arg11: memref<1x128xf32, #tpu.memory_space<vmem>>, %arg12: memref<256x128xbf16, #tpu.memory_space<vmem>>, %arg13: memref<1x128xf32, #tpu.memory_space<vmem>>, %arg14: memref<8x128xbf16, #tpu.memory_space<vmem>>) attributes {dimension_semantics = [], scalar_prefetch = 0 : i64, scratch_operands = 0 : i64, tpu.core_type = #tpu.core_type<tc>} {
    %c0 = arith.constant 0 : index
    %c0_0 = arith.constant 0 : index
    %c0_1 = arith.constant 0 : index
    %0 = vector.load %arg0[%c0, %c0_0, %c0_1] : memref<8x8x128xbf16, #tpu.memory_space<vmem>>, vector<8x8x128xbf16>
    %1 = arith.extf %0 : vector<8x8x128xbf16> to vector<8x8x128xf32>
    %cst = arith.constant dense<0.000000e+00> : vector<8x128xf32>
    %2 = vector.multi_reduction <add>, %1, %cst [1] : vector<8x8x128xf32> to vector<8x128xf32>
    %cst_2 = arith.constant 1.250000e-01 : f32
    %3 = vector.broadcast %cst_2 : f32 to vector<8x128xf32>
    %4 = arith.mulf %2, %3 : vector<8x128xf32>
    %5 = arith.truncf %4 : vector<8x128xf32> to vector<8x128xbf16>
    %c0_3 = arith.constant 0 : index
    %c0_4 = arith.constant 0 : index
    %6 = vector.load %arg2[%c0_3, %c0_4] : memref<128x256xbf16, #tpu.memory_space<vmem>>, vector<128x256xbf16>
    %cst_5 = arith.constant dense<0.000000e+00> : vector<8x256xf32>
    %7 = tpu.matmul %5, %6, %cst_5 {dimension_numbers = #tpu.dot_dimension_numbers<[1], [0], [0], [1], [0, 0, 1, 1], [], []>} : vector<8x128xbf16>, vector<128x256xbf16>, vector<8x256xf32> -> vector<8x256xf32>
    %c0_6 = arith.constant 0 : index
    %c0_7 = arith.constant 0 : index
    %8 = vector.load %arg3[%c0_6, %c0_7] : memref<1x256xf32, #tpu.memory_space<vmem>>, vector<1x256xf32>
    %9 = vector.broadcast %8 : vector<1x256xf32> to vector<8x256xf32>
    %10 = arith.addf %7, %9 : vector<8x256xf32>
    %11 = math.tanh %10 : vector<8x256xf32>
    %12 = vector.extract_strided_slice %11 {offsets = [0, 0], sizes = [8, 128], strides = [1, 1]} : vector<8x256xf32> to vector<8x128xf32>
    %13 = vector.extract_strided_slice %11 {offsets = [0, 128], sizes = [8, 128], strides = [1, 1]} : vector<8x256xf32> to vector<8x128xf32>
    %14 = arith.truncf %12 : vector<8x128xf32> to vector<8x128xbf16>
    %c0_8 = arith.constant 0 : index
    %c0_9 = arith.constant 0 : index
    %15 = vector.load %arg1[%c0_8, %c0_9] : memref<8x256xbf16, #tpu.memory_space<vmem>>, vector<8x256xbf16>
    %16 = tpu.concatenate %15, %14 in 1 : vector<8x256xbf16>, vector<8x128xbf16> -> vector<8x384xbf16>
    %c0_10 = arith.constant 0 : index
    %c0_11 = arith.constant 0 : index
    %17 = vector.load %arg4[%c0_10, %c0_11] : memref<384x1024xbf16, #tpu.memory_space<vmem>>, vector<384x1024xbf16>
    %cst_12 = arith.constant dense<0.000000e+00> : vector<8x1024xf32>
    %18 = tpu.matmul %16, %17, %cst_12 {dimension_numbers = #tpu.dot_dimension_numbers<[1], [0], [0], [1], [0, 0, 1, 1], [], []>} : vector<8x384xbf16>, vector<384x1024xbf16>, vector<8x1024xf32> -> vector<8x1024xf32>
    %c0_13 = arith.constant 0 : index
    %c0_14 = arith.constant 0 : index
    %19 = vector.load %arg5[%c0_13, %c0_14] : memref<1x1024xf32, #tpu.memory_space<vmem>>, vector<1x1024xf32>
    %20 = vector.broadcast %19 : vector<1x1024xf32> to vector<8x1024xf32>
    %21 = arith.addf %18, %20 : vector<8x1024xf32>
    %22 = vector.extract_strided_slice %21 {offsets = [0, 0], sizes = [8, 128], strides = [1, 1]} : vector<8x1024xf32> to vector<8x128xf32>
    %23 = arith.negf %22 : vector<8x128xf32>
    %24 = math.exp %23 : vector<8x128xf32>
    %cst_15 = arith.constant 1.000000e+00 : f32
    %25 = vector.broadcast %cst_15 : f32 to vector<8x128xf32>
    %26 = arith.addf %25, %24 : vector<8x128xf32>
    %27 = arith.divf %25, %26 : vector<8x128xf32>
    %28 = vector.extract_strided_slice %21 {offsets = [0, 128], sizes = [8, 128], strides = [1, 1]} : vector<8x1024xf32> to vector<8x128xf32>
    %29 = arith.negf %28 : vector<8x128xf32>
    %30 = math.exp %29 : vector<8x128xf32>
    %cst_16 = arith.constant 1.000000e+00 : f32
    %31 = vector.broadcast %cst_16 : f32 to vector<8x128xf32>
    %32 = arith.addf %31, %30 : vector<8x128xf32>
    %33 = arith.divf %31, %32 : vector<8x128xf32>
    %34 = vector.extract_strided_slice %21 {offsets = [0, 256], sizes = [8, 128], strides = [1, 1]} : vector<8x1024xf32> to vector<8x128xf32>
    %35 = math.tanh %34 : vector<8x128xf32>
    %36 = vector.extract_strided_slice %21 {offsets = [0, 384], sizes = [8, 128], strides = [1, 1]} : vector<8x1024xf32> to vector<8x128xf32>
    %37 = arith.negf %36 : vector<8x128xf32>
    %38 = math.exp %37 : vector<8x128xf32>
    %cst_17 = arith.constant 1.000000e+00 : f32
    %39 = vector.broadcast %cst_17 : f32 to vector<8x128xf32>
    %40 = arith.addf %39, %38 : vector<8x128xf32>
    %41 = arith.divf %39, %40 : vector<8x128xf32>
    %42 = arith.mulf %33, %13 : vector<8x128xf32>
    %43 = arith.mulf %27, %35 : vector<8x128xf32>
    %44 = arith.addf %42, %43 : vector<8x128xf32>
    %45 = math.tanh %44 : vector<8x128xf32>
    %46 = arith.mulf %41, %45 : vector<8x128xf32>
    %47 = vector.extract_strided_slice %21 {offsets = [0, 512], sizes = [8, 128], strides = [1, 1]} : vector<8x1024xf32> to vector<8x128xf32>
    %48 = arith.negf %47 : vector<8x128xf32>
    %49 = math.exp %48 : vector<8x128xf32>
    %cst_18 = arith.constant 1.000000e+00 : f32
    %50 = vector.broadcast %cst_18 : f32 to vector<8x128xf32>
    %51 = arith.addf %50, %49 : vector<8x128xf32>
    %52 = arith.divf %50, %51 : vector<8x128xf32>
    %53 = vector.extract_strided_slice %21 {offsets = [0, 640], sizes = [8, 128], strides = [1, 1]} : vector<8x1024xf32> to vector<8x128xf32>
    %54 = arith.negf %53 : vector<8x128xf32>
    %55 = math.exp %54 : vector<8x128xf32>
    %cst_19 = arith.constant 1.000000e+00 : f32
    %56 = vector.broadcast %cst_19 : f32 to vector<8x128xf32>
    %57 = arith.addf %56, %55 : vector<8x128xf32>
    %58 = arith.divf %56, %57 : vector<8x128xf32>
    %59 = vector.extract_strided_slice %21 {offsets = [0, 768], sizes = [8, 128], strides = [1, 1]} : vector<8x1024xf32> to vector<8x128xf32>
    %60 = math.tanh %59 : vector<8x128xf32>
    %61 = vector.extract_strided_slice %21 {offsets = [0, 896], sizes = [8, 128], strides = [1, 1]} : vector<8x1024xf32> to vector<8x128xf32>
    %62 = arith.negf %61 : vector<8x128xf32>
    %63 = math.exp %62 : vector<8x128xf32>
    %cst_20 = arith.constant 1.000000e+00 : f32
    %64 = vector.broadcast %cst_20 : f32 to vector<8x128xf32>
    %65 = arith.addf %64, %63 : vector<8x128xf32>
    %66 = arith.divf %64, %65 : vector<8x128xf32>
    %67 = arith.mulf %58, %13 : vector<8x128xf32>
    %68 = arith.mulf %52, %60 : vector<8x128xf32>
    %69 = arith.addf %67, %68 : vector<8x128xf32>
    %70 = math.tanh %69 : vector<8x128xf32>
    %71 = arith.mulf %66, %70 : vector<8x128xf32>
    %72 = arith.truncf %46 : vector<8x128xf32> to vector<8x128xbf16>
    %73 = arith.truncf %71 : vector<8x128xf32> to vector<8x128xbf16>
    %74 = tpu.concatenate %72, %73, %14 in 1 : vector<8x128xbf16>, vector<8x128xbf16>, vector<8x128xbf16> -> vector<8x384xbf16>
    %c0_21 = arith.constant 0 : index
    %c0_22 = arith.constant 0 : index
    %75 = vector.load %arg6[%c0_21, %c0_22] : memref<384x512xbf16, #tpu.memory_space<vmem>>, vector<384x512xbf16>
    %cst_23 = arith.constant dense<0.000000e+00> : vector<8x512xf32>
    %76 = tpu.matmul %74, %75, %cst_23 {dimension_numbers = #tpu.dot_dimension_numbers<[1], [0], [0], [1], [0, 0, 1, 1], [], []>} : vector<8x384xbf16>, vector<384x512xbf16>, vector<8x512xf32> -> vector<8x512xf32>
    %c0_24 = arith.constant 0 : index
    %c0_25 = arith.constant 0 : index
    %77 = vector.load %arg7[%c0_24, %c0_25] : memref<1x512xf32, #tpu.memory_space<vmem>>, vector<1x512xf32>
    %78 = vector.broadcast %77 : vector<1x512xf32> to vector<8x512xf32>
    %79 = arith.addf %76, %78 : vector<8x512xf32>
    %80 = vector.extract_strided_slice %79 {offsets = [0, 0], sizes = [8, 128], strides = [1, 1]} : vector<8x512xf32> to vector<8x128xf32>
    %81 = arith.negf %80 : vector<8x128xf32>
    %82 = math.exp %81 : vector<8x128xf32>
    %cst_26 = arith.constant 1.000000e+00 : f32
    %83 = vector.broadcast %cst_26 : f32 to vector<8x128xf32>
    %84 = arith.addf %83, %82 : vector<8x128xf32>
    %85 = arith.divf %83, %84 : vector<8x128xf32>
    %86 = vector.extract_strided_slice %79 {offsets = [0, 128], sizes = [8, 128], strides = [1, 1]} : vector<8x512xf32> to vector<8x128xf32>
    %87 = arith.negf %86 : vector<8x128xf32>
    %88 = math.exp %87 : vector<8x128xf32>
    %cst_27 = arith.constant 1.000000e+00 : f32
    %89 = vector.broadcast %cst_27 : f32 to vector<8x128xf32>
    %90 = arith.addf %89, %88 : vector<8x128xf32>
    %91 = arith.divf %89, %90 : vector<8x128xf32>
    %92 = vector.extract_strided_slice %79 {offsets = [0, 256], sizes = [8, 128], strides = [1, 1]} : vector<8x512xf32> to vector<8x128xf32>
    %93 = math.tanh %92 : vector<8x128xf32>
    %94 = vector.extract_strided_slice %79 {offsets = [0, 384], sizes = [8, 128], strides = [1, 1]} : vector<8x512xf32> to vector<8x128xf32>
    %95 = arith.negf %94 : vector<8x128xf32>
    %96 = math.exp %95 : vector<8x128xf32>
    %cst_28 = arith.constant 1.000000e+00 : f32
    %97 = vector.broadcast %cst_28 : f32 to vector<8x128xf32>
    %98 = arith.addf %97, %96 : vector<8x128xf32>
    %99 = arith.divf %97, %98 : vector<8x128xf32>
    %100 = arith.mulf %91, %13 : vector<8x128xf32>
    %101 = arith.mulf %85, %93 : vector<8x128xf32>
    %102 = arith.addf %100, %101 : vector<8x128xf32>
    %103 = math.tanh %102 : vector<8x128xf32>
    %104 = arith.mulf %99, %103 : vector<8x128xf32>
    %105 = arith.truncf %104 : vector<8x128xf32> to vector<8x128xbf16>
    %106 = vector.shape_cast %0 : vector<8x8x128xbf16> to vector<64x128xbf16>
    %c0_29 = arith.constant 0 : index
    %c0_30 = arith.constant 0 : index
    %107 = vector.load %arg9[%c0_29, %c0_30] : memref<128x128xbf16, #tpu.memory_space<vmem>>, vector<128x128xbf16>
    %cst_31 = arith.constant dense<0.000000e+00> : vector<64x128xf32>
    %108 = tpu.matmul %106, %107, %cst_31 {dimension_numbers = #tpu.dot_dimension_numbers<[1], [0], [0], [1], [0, 0, 1, 1], [], []>} : vector<64x128xbf16>, vector<128x128xbf16>, vector<64x128xf32> -> vector<64x128xf32>
    %109 = vector.shape_cast %108 : vector<64x128xf32> to vector<8x8x128xf32>
    %c0_32 = arith.constant 0 : index
    %c0_33 = arith.constant 0 : index
    %110 = vector.load %arg8[%c0_32, %c0_33] : memref<128x128xbf16, #tpu.memory_space<vmem>>, vector<128x128xbf16>
    %cst_34 = arith.constant dense<0.000000e+00> : vector<8x128xf32>
    %111 = tpu.matmul %105, %110, %cst_34 {dimension_numbers = #tpu.dot_dimension_numbers<[1], [0], [0], [1], [0, 0, 1, 1], [], []>} : vector<8x128xbf16>, vector<128x128xbf16>, vector<8x128xf32> -> vector<8x128xf32>
    %c0_35 = arith.constant 0 : index
    %c0_36 = arith.constant 0 : index
    %112 = vector.load %arg10[%c0_35, %c0_36] : memref<1x128xf32, #tpu.memory_space<vmem>>, vector<1x128xf32>
    %113 = vector.broadcast %112 : vector<1x128xf32> to vector<8x128xf32>
    %114 = arith.addf %111, %113 : vector<8x128xf32>
    %115 = vector.shape_cast %114 : vector<8x128xf32> to vector<8x1x128xf32>
    %116 = vector.broadcast %115 : vector<8x1x128xf32> to vector<8x8x128xf32>
    %117 = arith.addf %116, %109 : vector<8x8x128xf32>
    %118 = math.tanh %117 : vector<8x8x128xf32>
    %c0_37 = arith.constant 0 : index
    %c0_38 = arith.constant 0 : index
    %119 = vector.load %arg11[%c0_37, %c0_38] : memref<1x128xf32, #tpu.memory_space<vmem>>, vector<1x128xf32>
    %120 = vector.shape_cast %119 : vector<1x128xf32> to vector<1x1x128xf32>
    %121 = vector.broadcast %120 : vector<1x1x128xf32> to vector<8x8x128xf32>
    %122 = arith.mulf %118, %121 : vector<8x8x128xf32>
    %cst_39 = arith.constant dense<0.000000e+00> : vector<8x8xf32>
    %123 = vector.multi_reduction <add>, %122, %cst_39 [2] : vector<8x8x128xf32> to vector<8x8xf32>
    %cst_40 = arith.constant dense<0xFF800000> : vector<8xf32>
    %124 = vector.multi_reduction <maximumf>, %123, %cst_40 [1] : vector<8x8xf32> to vector<8xf32>
    %125 = vector.shape_cast %124 : vector<8xf32> to vector<8x1xf32>
    %126 = vector.broadcast %125 : vector<8x1xf32> to vector<8x8xf32>
    %127 = arith.subf %123, %126 : vector<8x8xf32>
    %128 = math.exp %127 : vector<8x8xf32>
    %cst_41 = arith.constant dense<0.000000e+00> : vector<8xf32>
    %129 = vector.multi_reduction <add>, %128, %cst_41 [1] : vector<8x8xf32> to vector<8xf32>
    %130 = vector.shape_cast %129 : vector<8xf32> to vector<8x1xf32>
    %131 = tpu.reciprocal %130 {approx = true} : vector<8x1xf32> -> vector<8x1xf32>
    %132 = vector.broadcast %131 : vector<8x1xf32> to vector<8x8xf32>
    %133 = arith.mulf %128, %132 : vector<8x8xf32>
    %134 = vector.shape_cast %133 : vector<8x8xf32> to vector<8x1x8xf32>
    %135 = arith.truncf %134 : vector<8x1x8xf32> to vector<8x1x8xbf16>
    "tpu.trace_start"() <{level = 10 : i32, message = "bqs,bsh->bqh"}> : () -> ()
    %cst_42 = arith.constant dense<0.000000e+00> : vector<8x1x128xf32>
    %136 = tpu.matmul %135, %0, %cst_42 {dimension_numbers = #tpu.dot_dimension_numbers<[2], [1], [1], [2], [0, 0, 0, 1, 1, 2], [0], [0]>} : vector<8x1x8xbf16>, vector<8x8x128xbf16>, vector<8x1x128xf32> -> vector<8x1x128xf32>
    "tpu.trace_stop"() : () -> ()
    %137 = vector.shape_cast %136 : vector<8x1x128xf32> to vector<8x128xf32>
    %138 = arith.truncf %137 : vector<8x128xf32> to vector<8x128xbf16>
    %139 = tpu.concatenate %138, %105 in 1 : vector<8x128xbf16>, vector<8x128xbf16> -> vector<8x256xbf16>
    %c0_43 = arith.constant 0 : index
    %c0_44 = arith.constant 0 : index
    %140 = vector.load %arg12[%c0_43, %c0_44] : memref<256x128xbf16, #tpu.memory_space<vmem>>, vector<256x128xbf16>
    %cst_45 = arith.constant dense<0.000000e+00> : vector<8x128xf32>
    %141 = tpu.matmul %139, %140, %cst_45 {dimension_numbers = #tpu.dot_dimension_numbers<[1], [0], [0], [1], [0, 0, 1, 1], [], []>} : vector<8x256xbf16>, vector<256x128xbf16>, vector<8x128xf32> -> vector<8x128xf32>
    %c0_46 = arith.constant 0 : index
    %c0_47 = arith.constant 0 : index
    %142 = vector.load %arg13[%c0_46, %c0_47] : memref<1x128xf32, #tpu.memory_space<vmem>>, vector<1x128xf32>
    %143 = vector.broadcast %142 : vector<1x128xf32> to vector<8x128xf32>
    %144 = arith.addf %141, %143 : vector<8x128xf32>
    %145 = math.tanh %144 : vector<8x128xf32>
    %146 = arith.truncf %145 : vector<8x128xf32> to vector<8x128xbf16>
    %c0_48 = arith.constant 0 : index
    %c0_49 = arith.constant 0 : index
    %147 = vector.load %arg14[%c0_48, %c0_49] : memref<8x128xbf16, #tpu.memory_space<vmem>>, vector<8x128xbf16>
    tpu.vector_store %arg14[%c0_48, %c0_49], %146 {strides = array<i32>} : memref<8x128xbf16, #tpu.memory_space<vmem>>, vector<8x128xbf16>,
    return
  }
}

</mosaic_0001>

<bundles_post_ra>
// kernel: tpu_custom_call.1
= control target key start
LH: loop header
LB: loop body
LE: loop exit
PB: predicated region body
PF: predicated region fallthrough
CT: control target
= control target key end

     0   :  { %19 = vsyncpa [#allocation3], 0  ;;  %s5744_s0 = inlined_call_operand.hbm [shape: bf16[8,8,128], index: 0, kind: input, shape index: {}]   ;;  %s5745_s1 = inlined_call_operand.hbm [shape: bf16[8,256], index: 1, kind: input, shape index: {}]   ;;  %s5746_s2 = inlined_call_operand.hbm [shape: bf16[128,256], index: 2, kind: input, shape index: {}]   ;;  %s5747_s3 = inlined_call_operand.vmem [shape: f32[1,256], index: 3, kind: input, shape index: {}]   ;;  %s5748_s4 = inlined_call_operand.hbm [shape: bf16[384,1024], index: 4, kind: input, shape index: {}]   ;;  %s5749_s5 = inlined_call_operand.vmem [shape: f32[1,1024], index: 5, kind: input, shape index: {}]   ;;  %s5750_s6 = inlined_call_operand.hbm [shape: bf16[384,512], index: 6, kind: input, shape index: {}]   ;;  %s5751_s7 = inlined_call_operand.vmem [shape: f32[1,512], index: 7, kind: input, shape index: {}]   ;;  %s5752_s8 = inlined_call_operand.hbm [shape: bf16[128,128], index: 8, kind: input, shape index: {}]   ;;  %s5753_s9 = inlined_call_operand.hbm [shape: bf16[128,128], index: 9, kind: input, shape index: {}]   ;;  %s5754_s10 = inlined_call_operand.vmem [shape: f32[1,128], index: 10, kind: input, shape index: {}]   ;;  %s5755_s11 = inlined_call_operand.vmem [shape: f32[1,128], index: 11, kind: input, shape index: {}]   ;;  %s5756_s12 = inlined_call_operand.hbm [shape: bf16[256,128], index: 12, kind: input, shape index: {}]   ;;  %s5757_s13 = inlined_call_operand.vmem [shape: f32[1,128], index: 13, kind: input, shape index: {}]   ;;  %s5758_s14 = inlined_call_operand.hbm [shape: bf16[8,128], index: 14, kind: output, shape index: {}]  }
   0x1   :  { %20 = vsyncpa [#allocation6], 0 }
   0x2   :  { %21 = vsyncpa [#allocation9], 0 }
   0x3   :  { %22 = vsyncpa [#allocation12], 0 }
   0x4   :  { %23 = vsyncpa [#allocation15], 0 }
   0x5   :  { %24 = vsyncpa [#allocation4], 0  ;;  %s5210_s29 = smov [#allocation5]   ;;  %s5211_s15 = smov [#allocation8]  }
   0x6   :  { %s43_s30 = sshll.u32 %s5210_s29, 4  ;;  %s66_s16 = sshll.u32 %s5211_s15, 4  ;;  %s44_s30 = int_to_ptr.vmem [resolvable:$true] %s43_s30  ;;  %s5306_s16 = int_to_ptr.vmem [resolvable:$true] %s66_s16 }
   0x7   :  { %s5000_s19 = scalar_lea.hbm %s5745_s1, 128 }
   0x8   :  { %p5001_p0 = scmp.ne.s32.totalorder %s5745_s1, %s5000_s19  ;;  %p5004_p1 = scmp.lt.u32.totalorder %s5000_s19, %s5745_s1 }
   0xa   :  { %p5006_p2 = pnand %p5004_p1, %p5001_p0 }
   0xc   :  { %5009 = shalt.err (!%p5006_p2)
}
   0xd   :  { %s5010_s24 = scalar_lea.vmem %s44_s30, 128  ;;  %p5015_p4 = scmp.lt.s32.totalorder %s44_s30, %s44_s30 }
   0xe   :  { %p5011_p3 = scmp.ne.s32.totalorder %s44_s30, %s5010_s24  ;;  %p5016_p5 = scmp.lt.s32.totalorder %s5010_s24, %s5010_s24 }
  0x10   :  { %p5017_p6 = por %p5016_p5, %p5015_p4 }
  0x12   :  { %p5018_p7 = pnand %p5017_p6, %p5011_p3 }
  0x14   :  { %5021 = shalt.err (!%p5018_p7)
}
  0x15   :  { %46 = dma.hbm_to_vmem [thread:$0]  %s5745_s1, 128, %s44_s30, [#allocation6]  }
  0x16   :  { %s5022_s29 = scalar_lea.hbm %s5748_s4, 24576 }
  0x17   :  { %p5023_p8 = scmp.ne.s32.totalorder %s5748_s4, %s5022_s29  ;;  %p5026_p9 = scmp.lt.u32.totalorder %s5022_s29, %s5748_s4 }
  0x19   :  { %p5028_p10 = pnand %p5026_p9, %p5023_p8 }
  0x1b   :  { %5031 = shalt.err (!%p5028_p10)
}
  0x1c   :  { %s5032_s20 = scalar_lea.vmem %s5306_s16, 24576  ;;  %p5037_p12 = scmp.lt.s32.totalorder %s5306_s16, %s5306_s16 }
  0x1d   :  { %p5033_p11 = scmp.ne.s32.totalorder %s5306_s16, %s5032_s20  ;;  %p5038_p13 = scmp.lt.s32.totalorder %s5032_s20, %s5032_s20 }
  0x1f   :  { %p5039_p0 = por %p5038_p13, %p5037_p12 }
  0x21   :  { %p5040_p1 = pnand %p5039_p0, %p5033_p11 }
  0x23   :  { %5043 = shalt.err (!%p5040_p1)
}
  0x24   :  { %s5212_s1 = smov 512   ;;  %s5213_s30 = smov 32  }
  0x25   :  { %72 = dma.hbm_to_vmem [thread:$0]  %s5748_s4, 24576, %s5306_s16, [#allocation9], %s5212_s1, %s5212_s1, %s5213_s30  }
  0x26   :  { %s5214_s23 = smov [#allocation11]   ;;  %s5215_s25 = smov [#allocation2]  }
  0x27   :  { %s94_s24 = sshll.u32 %s5214_s23, 4  ;;  %s30_s26 = sshll.u32 %s5215_s25, 4  ;;  %s95_s24 = int_to_ptr.vmem [resolvable:$true] %s94_s24  ;;  %s5337_s26 = int_to_ptr.vmem [resolvable:$true] %s30_s26 }
  0x28   :  { %s5044_s29 = scalar_lea.hbm %s5752_s8, 1024 }
  0x29   :  { %p5045_p2 = scmp.ne.s32.totalorder %s5752_s8, %s5044_s29  ;;  %p5048_p3 = scmp.lt.u32.totalorder %s5044_s29, %s5752_s8 }
  0x2b   :  { %p5050_p4 = pnand %p5048_p3, %p5045_p2 }
  0x2d   :  { %5053 = shalt.err (!%p5050_p4)
}
  0x2e   :  { %s5054_s4 = scalar_lea.vmem %s95_s24, 1024  ;;  %p5059_p6 = scmp.lt.s32.totalorder %s95_s24, %s95_s24 }
  0x2f   :  { %p5055_p5 = scmp.ne.s32.totalorder %s95_s24, %s5054_s4  ;;  %p5060_p7 = scmp.lt.s32.totalorder %s5054_s4, %s5054_s4 }
  0x31   :  { %p5061_p8 = por %p5060_p7, %p5059_p6 }
  0x33   :  { %p5062_p9 = pnand %p5061_p8, %p5055_p5 }
  0x35   :  { %5065 = shalt.err (!%p5062_p9)
}
  0x36   :  { %s5216_s16 = smov 64   ;;  %s5217_s20 = smov 4  }
  0x37   :  { %100 = dma.hbm_to_vmem [thread:$0]  %s5752_s8, 1024, %s95_s24, [#allocation12], %s5216_s16, %s5216_s16, %s5217_s20  }
  0x38   :  { %s5066_s23 = scalar_lea.hbm %s5744_s0, 512 }
  0x39   :  { %p5067_p10 = scmp.ne.s32.totalorder %s5744_s0, %s5066_s23  ;;  %p5070_p11 = scmp.lt.u32.totalorder %s5066_s23, %s5744_s0 }
  0x3b   :  { %p5072_p12 = pnand %p5070_p11, %p5067_p10 }
  0x3d   :  { %5075 = shalt.err (!%p5072_p12)
}
  0x3e   :  { %s5076_s15 = scalar_lea.vmem %s5337_s26, 512  ;;  %p5081_p0 = scmp.lt.s32.totalorder %s5337_s26, %s5337_s26 }
  0x3f   :  { %p5077_p13 = scmp.ne.s32.totalorder %s5337_s26, %s5076_s15  ;;  %p5082_p1 = scmp.lt.s32.totalorder %s5076_s15, %s5076_s15 }
  0x41   :  { %p5083_p2 = por %p5082_p1, %p5081_p0 }
  0x43   :  { %p5084_p3 = pnand %p5083_p2, %p5077_p13 }
  0x45   :  { %5087 = shalt.err (!%p5084_p3)
}
  0x46   :  { %36 = dma.hbm_to_vmem [thread:$0]  %s5744_s0, 512, %s5337_s26, [#allocation3], %s5216_s16, %s5216_s16, %s5217_s20  }
  0x47   :  { %s5218_s17 = smov [#allocation7]   ;;  %s5088_s1 = scalar_lea.hbm %s5746_s2, 2048 }
  0x48   :  { %s52_s18 = sshll.u32 %s5218_s17, 4  ;;  %p5089_p4 = scmp.ne.s32.totalorder %s5746_s2, %s5088_s1  ;;  %s53_s18 = int_to_ptr.vmem [resolvable:$true] %s52_s18 }
  0x49   :  { %p5092_p5 = scmp.lt.u32.totalorder %s5088_s1, %s5746_s2 }
  0x4b   :  { %p5094_p6 = pnand %p5092_p5, %p5089_p4 }
  0x4d   :  { %5097 = shalt.err (!%p5094_p6)
}
  0x4e   :  { %s5098_s25 = scalar_lea.vmem %s53_s18, 2048  ;;  %p5103_p8 = scmp.lt.s32.totalorder %s53_s18, %s53_s18 }
  0x4f   :  { %p5099_p7 = scmp.ne.s32.totalorder %s53_s18, %s5098_s25  ;;  %p5104_p9 = scmp.lt.s32.totalorder %s5098_s25, %s5098_s25 }
  0x51   :  { %p5105_p10 = por %p5104_p9, %p5103_p8 }
  0x53   :  { %p5106_p11 = pnand %p5105_p10, %p5099_p7 }
  0x55   :  { %5109 = shalt.err (!%p5106_p11)
}
  0x56   :  { %s5219_s0 = smov 128   ;;  %s5220_s26 = smov 8  }
  0x57   :  { %58 = dma.hbm_to_vmem [thread:$0]  %s5746_s2, 2048, %s53_s18, [#allocation6], %s5219_s0, %s5219_s0, %s5220_s26  }
  0x58   :  { %s5221_s29 = smov [#allocation10]   ;;  %s5110_s17 = scalar_lea.hbm %s5750_s6, 12288 }
  0x59   :  { %s80_s15 = sshll.u32 %s5221_s29, 4  ;;  %p5111_p12 = scmp.ne.s32.totalorder %s5750_s6, %s5110_s17  ;;  %s81_s15 = int_to_ptr.vmem [resolvable:$true] %s80_s15 }
  0x5a   :  { %p5114_p13 = scmp.lt.u32.totalorder %s5110_s17, %s5750_s6 }
  0x5c   :  { %p5116_p0 = pnand %p5114_p13, %p5111_p12 }
  0x5e   :  { %5119 = shalt.err (!%p5116_p0)
}
  0x5f   :  { %s5120_s21 = scalar_lea.vmem %s81_s15, 12288  ;;  %p5125_p2 = scmp.lt.s32.totalorder %s81_s15, %s81_s15 }
  0x60   :  { %p5121_p1 = scmp.ne.s32.totalorder %s81_s15, %s5120_s21  ;;  %p5126_p3 = scmp.lt.s32.totalorder %s5120_s21, %s5120_s21 }
  0x62   :  { %p5127_p4 = por %p5126_p3, %p5125_p2 }
  0x64   :  { %p5128_p5 = pnand %p5127_p4, %p5121_p1 }
  0x66   :  { %5131 = shalt.err (!%p5128_p5)
}
  0x67   :  { %s5222_s2 = smov 256   ;;  %s5223_s18 = smov 16  }
  0x68   :  { %86 = dma.hbm_to_vmem [thread:$0]  %s5750_s6, 12288, %s81_s15, [#allocation9], %s5222_s2, %s5222_s2, %s5223_s18  }
  0x69   :  { %s5224_s25 = smov [#allocation13]   ;;  %s5225_s26 = smov [#allocation14]  }
  0x6a   :  { %s106_s0 = sshll.u32 %s5224_s25, 4  ;;  %s122_s27 = sshll.u32 %s5225_s26, 4  ;;  %s107_s0 = int_to_ptr.vmem [resolvable:$true] %s106_s0  ;;  %s5398_s27 = int_to_ptr.vmem [resolvable:$true] %s122_s27 }
  0x6b   :  { %s5132_s8 = scalar_lea.hbm %s5753_s9, 1024 }
  0x6c   :  { %p5133_p6 = scmp.ne.s32.totalorder %s5753_s9, %s5132_s8  ;;  %p5136_p7 = scmp.lt.u32.totalorder %s5132_s8, %s5753_s9 }
  0x6e   :  { %p5138_p8 = pnand %p5136_p7, %p5133_p6 }
  0x70   :  { %5141 = shalt.err (!%p5138_p8)
}
  0x71   :  { %s5142_s6 = scalar_lea.vmem %s107_s0, 1024  ;;  %p5147_p10 = scmp.lt.s32.totalorder %s107_s0, %s107_s0 }
  0x72   :  { %p5143_p9 = scmp.ne.s32.totalorder %s107_s0, %s5142_s6  ;;  %p5148_p11 = scmp.lt.s32.totalorder %s5142_s6, %s5142_s6 }
  0x74   :  { %p5149_p12 = por %p5148_p11, %p5147_p10 }
  0x76   :  { %p5150_p13 = pnand %p5149_p12, %p5143_p9 }
  0x78   :  { %5153 = shalt.err (!%p5150_p13)
}
  0x79   :  { %112 = dma.hbm_to_vmem [thread:$0]  %s5753_s9, 1024, %s107_s0, [#allocation12], %s5216_s16, %s5216_s16, %s5217_s20  }
  0x7a   :  { %s5154_s2 = scalar_lea.hbm %s5756_s12, 2048 }
  0x7b   :  { %p5155_p0 = scmp.ne.s32.totalorder %s5756_s12, %s5154_s2  ;;  %p5158_p1 = scmp.lt.u32.totalorder %s5154_s2, %s5756_s12 }
  0x7d   :  { %p5160_p2 = pnand %p5158_p1, %p5155_p0 }
  0x7f   :  { %5163 = shalt.err (!%p5160_p2)
}
  0x80   :  { %s5164_s26 = scalar_lea.vmem %s5398_s27, 2048  ;;  %p5169_p4 = scmp.lt.s32.totalorder %s5398_s27, %s5398_s27 }
  0x81   :  { %p5165_p3 = scmp.ne.s32.totalorder %s5398_s27, %s5164_s26  ;;  %p5170_p5 = scmp.lt.s32.totalorder %s5164_s26, %s5164_s26 }
  0x83   :  { %p5171_p6 = por %p5170_p5, %p5169_p4 }
  0x85   :  { %p5172_p7 = pnand %p5171_p6, %p5165_p3 }
  0x87   :  { %5175 = shalt.err (!%p5172_p7)
}
  0x88   :  { %128 = dma.hbm_to_vmem [thread:$0]  %s5756_s12, 2048, %s5398_s27, [#allocation15], %s5216_s16, %s5216_s16, %s5217_s20  }
  0x89   :  { %5198 = dma.done.wait [#allocation3], 512  }
  0x8a   :  { %5199 = vsyncadd [#allocation3], 4294966784 }
  0x8b   :  { %5200 = dma.done.wait [#allocation6], 2176  }
  0x8c   :  { %5201 = vsyncadd [#allocation6], 4294965120 }
  0x8d   :  { %5202 = dma.done.wait [#allocation9], 36864  }
  0x8e   :  { %5203 = vsyncadd [#allocation9], 4294930432 }
  0x8f   :  { %5204 = dma.done.wait [#allocation12], 2048  }
  0x90   :  { %5205 = vsyncadd [#allocation12], 4294965248 }
  0x91   :  { %5206 = dma.done.wait [#allocation15], 2048  }
  0x92   :  { %5207 = vsyncadd [#allocation15], 4294965248  ;;  %v5226_v0 = vmov 0   ;;  %v4698_v1 = vld [vmem:[#allocation7 + $0x4] ss:$8 sps:$4 sm:$0xff]   ;;  %vm280_vm0 = vcmask 1041409  }
  0x93   :  { %408 = vmatprep.mubr.bf16.mxu0 %v5226_v0  ;;  %4697 = vset.pattern.permute.xlu0 %v5226_v0  ;;  %v4700_v2 = vld [vmem:[#allocation7] ss:$8 sps:$4 sm:$0xff]   ;;  %v4701_v3 = vld [vmem:[#allocation7 + $0x14] ss:$8 sps:$4 sm:$0xff]   ;;  %v4703_v4 = vld [vmem:[#allocation7 + $0x10] ss:$8 sps:$4 sm:$0xff]  }
  0x94   :  { %4696 = vset.pattern.permute.xlu1 %v5226_v0  ;;  %376 = vmatprep.subr.bf16.mxu0 %v4698_v1  ;;  %v4704_v5 = vld [vmem:[#allocation7 + $0x24] ss:$8 sps:$4 sm:$0xff]   ;;  %v4706_v6 = vld [vmem:[#allocation7 + $0x20] ss:$8 sps:$4 sm:$0xff]   ;;  %v4707_v7 = vld [vmem:[#allocation7 + $0x34] ss:$8 sps:$4 sm:$0xff]  }
  0x95   :  { %377 = vmatpush1.bf16.msra.mxu0 %v4700_v2  ;;  %v4709_v8 = vld [vmem:[#allocation7 + $0x30] ss:$8 sps:$4 sm:$0xff]   ;;  %v4710_v9 = vld [vmem:[#allocation7 + $0x44] ss:$8 sps:$4 sm:$0xff]   ;;  %v157_v11 = vld [vmem:[#allocation2 + $0x4] sm:$0xf] }
  0x96   :  { %378 = vmatprep.subr.bf16.mxu0 %v4701_v3  ;;  %v156_v10 = vld [vmem:[#allocation2] sm:$0xf]  ;;  %v158_v12 = vld [vmem:[#allocation2 + $0x8] sm:$0xf]  ;;  %v159_v13 = vld [vmem:[#allocation2 + $0xc] sm:$0xf]  ;;  %v165_v18 = vunpack.c.l.bf16 %v157_v11 }
  0x97   :  { %v164_v14 = vunpack.c.l.bf16 %v156_v10  ;;  %v160_v15 = vld [vmem:[#allocation2 + $0x10] sm:$0xf]  ;;  %v161_v16 = vld [vmem:[#allocation2 + $0x14] sm:$0xf]  ;;  %v162_v17 = vld [vmem:[#allocation2 + $0x18] sm:$0xf]  ;;  %v166_v19 = vunpack.c.l.bf16 %v158_v12  ;;  %v167_v20 = vunpack.c.l.bf16 %v159_v13 }
  0x98   :  { %v163_v21 = vld [vmem:[#allocation2 + $0x1c] sm:$0xf]  ;;  %v168_v22 = vunpack.c.l.bf16 %v160_v15  ;;  %v169_v23 = vunpack.c.l.bf16 %v161_v16  ;;  %v170_v24 = vunpack.c.l.bf16 %v162_v17  ;;  %v178_v27 = vrot.slane %v165_v18, 4  ;;  %v4712_v30 = vld [vmem:[#allocation7 + $0x40] ss:$8 sps:$4 sm:$0xff]   ;;  %s5230_s24 = smov [#allocation16]  }
  0x99   :  { %379 = vmatpush1.bf16.msra.mxu0 %v4703_v4  ;;  %v172_v25 = vrot.slane %v164_v14, 4  ;;  %v171_v26 = vunpack.c.l.bf16 %v163_v21  ;;  %v184_v28 = vrot.slane %v166_v19, 4  ;;  %v190_v29 = vrot.slane %v167_v20, 4  ;;  %v4713_v35 = vld [vmem:[#allocation7 + $0x54] ss:$8 sps:$4 sm:$0xff]   ;;  %s4113_s17 = sshll.u32 %s5230_s24, 4  ;;  %s4114_s17 = int_to_ptr.vmem [resolvable:$true] %s4113_s17 }
  0x9a   :  { %380 = vmatprep.subr.bf16.mxu0 %v4704_v5  ;;  %v196_v32 = vrot.slane %v168_v22, 4  ;;  %v202_v33 = vrot.slane %v169_v23, 4  ;;  %v208_v34 = vrot.slane %v170_v24, 4  ;;  %v179_v36 = vadd.f32 %v178_v27, %v165_v18  ;;  %v4715_v48 = vld [vmem:[#allocation7 + $0x50] ss:$8 sps:$4 sm:$0xff]   ;;  %s5176_s19 = scalar_lea.vmem %s4114_s17, 64  ;;  %p5181_p9 = scmp.lt.s32.totalorder %s4114_s17, %s4114_s17 }
  0x9b   :  { %v173_v31 = vadd.f32 %v172_v25, %v164_v14  ;;  %v185_v37 = vadd.f32 %v184_v28, %v166_v19  ;;  %v191_v38 = vadd.f32 %v190_v29, %v167_v20  ;;  %v214_v39 = vrot.slane %v171_v26, 4  ;;  %v4716_v53 = vld [vmem:[#allocation7 + $0x64] ss:$8 sps:$4 sm:$0xff]   ;;  %v4718_v3 = vld [vmem:[#allocation7 + $0x60] ss:$8 sps:$4 sm:$0xff]   ;;  %p5177_p8 = scmp.ne.s32.totalorder %s4114_s17, %s5176_s19  ;;  %p5182_p10 = scmp.lt.s32.totalorder %s5176_s19, %s5176_s19 }
  0x9c   :  { %v197_v41 = vadd.f32 %v196_v32, %v168_v22  ;;  %v203_v42 = vadd.f32 %v202_v33, %v169_v23  ;;  %v209_v43 = vadd.f32 %v208_v34, %v170_v24  ;;  %v180_v44 = vrot.slane %v179_v36, 2  ;;  %v4721_v21 = vld [vmem:[#allocation7 + $0x70] ss:$8 sps:$4 sm:$0xff]  }
  0x9d   :  { %381 = vmatpush1.bf16.msra.mxu0 %v4706_v6  ;;  %v174_v40 = vrot.slane %v173_v31, 2  ;;  %v186_v45 = vrot.slane %v185_v37, 2  ;;  %v192_v46 = vrot.slane %v191_v38, 2  ;;  %v215_v47 = vadd.f32 %v214_v39, %v171_v26  ;;  %p5183_p11 = por %p5182_p10, %p5181_p9 }
  0x9e   :  { %382 = vmatprep.subr.bf16.mxu0 %v4707_v7  ;;  %v198_v50 = vrot.slane %v197_v41, 2  ;;  %v204_v51 = vrot.slane %v203_v42, 2  ;;  %v210_v52 = vrot.slane %v209_v43, 2  ;;  %v181_v54 = vadd.f32 %v180_v44, %v179_v36  ;;  %v429_v36 = vld [vmem:[#allocation8 + $0x8] sm:$0xff] }
  0x9f   :  { %v175_v49 = vadd.f32 %v174_v40, %v173_v31  ;;  %v187_v55 = vadd.f32 %v186_v45, %v185_v37  ;;  %v193_v56 = vadd.f32 %v192_v46, %v191_v38  ;;  %v216_v57 = vrot.slane %v215_v47, 2  ;;  %v432_v31 = vld [vmem:[#allocation8 + $0x20] sm:$0xff]  ;;  %v433_v37 = vld [vmem:[#allocation8 + $0x28] sm:$0xff]  ;;  %p5184_p12 = pnand %p5183_p11, %p5177_p8 }
  0xa0   :  { %v199_v59 = vadd.f32 %v198_v50, %v197_v41  ;;  %v205_v60 = vadd.f32 %v204_v51, %v203_v42  ;;  %v211_v61 = vadd.f32 %v210_v52, %v209_v43  ;;  %v182_v62 = vrot.slane %v181_v54, 1  ;;  %v436_v42 = vld [vmem:[#allocation8 + $0x40] sm:$0xff] }
  0xa1   :  { %383 = vmatpush1.bf16.msra.mxu0 %v4709_v8  ;;  %v176_v58 = vrot.slane %v175_v49, 1  ;;  %v188_v63 = vrot.slane %v187_v55, 1  ;;  %v194_v1 = vrot.slane %v193_v56, 1  ;;  %v217_v2 = vadd.f32 %v216_v57, %v215_v47  ;;  %v4719_v8 = vld [vmem:[#allocation7 + $0x74] ss:$8 sps:$4 sm:$0xff]   ;;  %v440_v43 = vld [vmem:[#allocation8 + $0x60] sm:$0xff] }
  0xa2   :  { %384 = vmatprep.subr.bf16.mxu0 %v4710_v9  ;;  %vm282_vm1 = vcmask 1042434   ;;  %v200_v5 = vrot.slane %v199_v59, 1  ;;  %v206_v6 = vrot.slane %v205_v60, 1  ;;  %v212_v7 = vrot.slane %v211_v61, 1 }
  0xa3   :  { %v177_v4 = vadd.f32 %v176_v58, %v175_v49  ;;  %v183_v9 = vadd.f32 %v182_v62, %v181_v54  ;;  %v189_v10 = vadd.f32 %v188_v63, %v187_v55  ;;  %v195_v11 = vadd.f32 %v194_v1, %v193_v56  ;;  %v448_v54 = vld [vmem:[#allocation8 + $0xa0] sm:$0xff] }
  0xa4   :  { %v218_v12 = vrot.slane %v217_v2, 1  ;;  %v201_v13 = vadd.f32 %v200_v5, %v199_v59  ;;  %v207_v14 = vadd.f32 %v206_v6, %v205_v60  ;;  %v213_v15 = vadd.f32 %v212_v7, %v211_v61  ;;  %v437_v60 = vld [vmem:[#allocation8 + $0x48] sm:$0xff]  ;;  %v452_v1 = vld [vmem:[#allocation8 + $0xc0] sm:$0xff] }
  0xa5   :  { %385 = vmatpush1.bf16.msra.mxu0 %v4712_v30  ;;  %v220_v16 = vmul.f32 0.125, %v177_v4  ;;  %v221_v18 = vmul.f32 0.125, %v183_v9  ;;  %v222_v19 = vmul.f32 0.125, %v189_v10  ;;  %v223_v20 = vmul.f32 0.125, %v195_v11  ;;  %v428_v30 = vld [vmem:[#allocation8] sm:$0xff]  ;;  %v441_v61 = vld [vmem:[#allocation8 + $0x68] sm:$0xff] }
  0xa6   :  { %386 = vmatprep.subr.bf16.mxu0 %v4713_v35  ;;  %v219_v17 = vadd.f32 %v218_v12, %v217_v2  ;;  %v224_v22 = vmul.f32 0.125, %v201_v13  ;;  %v225_v23 = vmul.f32 0.125, %v207_v14  ;;  %v226_v24 = vmul.f32 0.125, %v213_v15  ;;  %v456_v2 = vld [vmem:[#allocation8 + $0xe0] sm:$0xff]  ;;  %v449_v9 = vld [vmem:[#allocation8 + $0xa8] sm:$0xff] }
  0xa7   :  { %v228_v25 = vpack.c.bf16 %v220_v16, %v220_v16  ;;  %v229_v27 = vpack.c.bf16 %v221_v18, %v221_v18  ;;  %v230_v28 = vpack.c.bf16 %v222_v19, %v222_v19  ;;  %v231_v29 = vpack.c.bf16 %v223_v20, %v223_v20  ;;  %v460_v11 = vld [vmem:[#allocation8 + $0x100] sm:$0xff]  ;;  %v453_v14 = vld [vmem:[#allocation8 + $0xc8] sm:$0xff] }
  0xa8   :  { %v227_v26 = vmul.f32 0.125, %v219_v17  ;;  %v232_v32 = vpack.c.bf16 %v224_v22, %v224_v22  ;;  %v233_v33 = vpack.c.bf16 %v225_v23, %v225_v23  ;;  %v234_v34 = vpack.c.bf16 %v226_v24, %v226_v24  ;;  %v464_v12 = vld [vmem:[#allocation8 + $0x120] sm:$0xff]  ;;  %v457_v15 = vld [vmem:[#allocation8 + $0xe8] sm:$0xff] }
  0xa9   :  { %387 = vmatpush1.bf16.msra.mxu0 %v4715_v48  ;;  %v272_v35 = vunpack.c.l.b16 %v228_v25  ;;  %v273_v39 = vunpack.c.l.b16 %v229_v27  ;;  %v274_v40 = vunpack.c.l.b16 %v230_v28  ;;  %v275_v41 = vunpack.c.l.b16 %v231_v29  ;;  %v468_v18 = vld [vmem:[#allocation8 + $0x140] sm:$0xff]  ;;  %v461_v23 = vld [vmem:[#allocation8 + $0x108] sm:$0xff] }
  0xaa   :  { %388 = vmatprep.subr.bf16.mxu0 %v4716_v53  ;;  %v235_v38 = vpack.c.bf16 %v227_v26, %v227_v26  ;;  %v276_v44 = vunpack.c.l.b16 %v232_v32  ;;  %vm284_vm2 = vcmask 1043459   ;;  %vm286_vm3 = vcmask 1044484   ;;  %v444_v53 = vld [vmem:[#allocation8 + $0x80] sm:$0xff]  ;;  %v465_v24 = vld [vmem:[#allocation8 + $0x128] sm:$0xff] }
  0xab   :  { %v4145_v45 = vcombine.high %v428_v30, %v432_v31  ;;  %v277_v46 = vunpack.c.l.b16 %v233_v33  ;;  %v281_v47 = vsel %vm280_vm0, %v273_v39, %v272_v35  ;;  %vm288_vm4 = vcmask 1045509   ;;  %v472_v19 = vld [vmem:[#allocation8 + $0x160] sm:$0xff]  ;;  %v473_v32 = vld [vmem:[#allocation8 + $0x168] sm:$0xff] }
  0xac   :  { %v4147_v48 = vcombine.high %v429_v36, %v433_v37  ;;  %v278_v49 = vunpack.c.l.b16 %v234_v34  ;;  %v283_v50 = vsel %vm282_vm1, %v274_v40, %v281_v47  ;;  %v4144_v51 = vcombine.low %v428_v30, %v432_v31  ;;  %v476_v27 = vld [vmem:[#allocation8 + $0x180] sm:$0xff]  ;;  %v469_v31 = vld [vmem:[#allocation8 + $0x148] sm:$0xff] }
  0xad   :  { %389 = vmatpush1.bf16.msra.mxu0 %v4718_v3  ;;  %1622 = vmatprep.subr.bf16.mxu1 %v4145_v45  ;;  %v4153_v52 = vcombine.high %v436_v42, %v440_v43  ;;  %v279_v55 = vunpack.c.l.b16 %v235_v38  ;;  %v285_v56 = vsel %vm284_vm2, %v275_v41, %v283_v50  ;;  %vm290_vm5 = vcmask 1046534   ;;  %v480_v28 = vld [vmem:[#allocation8 + $0x1a0] sm:$0xff]  ;;  %v477_v40 = vld [vmem:[#allocation8 + $0x188] sm:$0xff] }
  0xae   :  { %390 = vmatprep.subr.bf16.mxu0 %v4719_v8  ;;  %v287_v57 = vsel %vm286_vm3, %v276_v44, %v285_v56  ;;  %vm292_vm6 = vcmask 1047559   ;;  %1623 = vmatpush1.bf16.msra.mxu1 %v4144_v51  ;;  %v4152_v58 = vcombine.low %v436_v42, %v440_v43  ;;  %v4161_v62 = vcombine.high %v444_v53, %v448_v54  ;;  %v445_v8 = vld [vmem:[#allocation8 + $0x88] sm:$0xff]  ;;  %v492_v44 = vld [vmem:[#allocation8 + $0x200] sm:$0xff] }
  0xaf   :  { %v289_v59 = vsel %vm288_vm4, %v277_v46, %v287_v57  ;;  %1624 = vmatprep.subr.bf16.mxu1 %v4153_v52  ;;  %v4146_v4 = vcombine.low %v429_v36, %v433_v37  ;;  %v4155_v6 = vcombine.high %v437_v60, %v441_v61  ;;  %v4160_v7 = vcombine.low %v444_v53, %v448_v54  ;;  %v484_v36 = vld [vmem:[#allocation8 + $0x1c0] sm:$0xff]  ;;  %v481_v41 = vld [vmem:[#allocation8 + $0x1a8] sm:$0xff] }
  0xb0   :  { %v291_v63 = vsel %vm290_vm5, %v278_v49, %v289_v59  ;;  %v4169_v10 = vcombine.high %v452_v1, %v456_v2  ;;  %v4154_v13 = vcombine.low %v437_v60, %v441_v61  ;;  %v4163_v16 = vcombine.high %v445_v8, %v449_v9  ;;  %v488_v37 = vld [vmem:[#allocation8 + $0x1e0] sm:$0xff]  ;;  %v489_v49 = vld [vmem:[#allocation8 + $0x1e8] sm:$0xff] }
  0xb1   :  { %391 = vmatpush1.bf16.msra.mxu0 %v4721_v21  ;;  %v293_v3 = vsel %vm292_vm6, %v279_v55, %v291_v63  ;;  %v4168_v17 = vcombine.low %v452_v1, %v456_v2  ;;  %v4177_v20 = vcombine.high %v460_v11, %v464_v12  ;;  %v5445_v21 = vld [vmem:[#allocation5] sm:$0xff]  ;;  %v4162_v22 = vcombine.low %v445_v8, %v449_v9  ;;  %v496_v45 = vld [vmem:[#allocation8 + $0x220] sm:$0xff]  ;;  %v493_v56 = vld [vmem:[#allocation8 + $0x208] sm:$0xff] }
  0xb2   :  { %1704 = vmatprep.subr.bf16.mxu0 %v4147_v48  ;;  %v294_v5 = vpack.c.b16 %v293_v3, %v293_v3  ;;  %1625 = vmatpush1.bf16.msra.mxu1 %v4152_v58  ;;  %v4171_v25 = vcombine.high %v453_v14, %v457_v15  ;;  %v4176_v26 = vcombine.low %v460_v11, %v464_v12  ;;  %v485_v48 = vld [vmem:[#allocation8 + $0x1c8] sm:$0xff]  ;;  %v500_v52 = vld [vmem:[#allocation8 + $0x240] sm:$0xff]  ;;  %vm5228_vm7 = vmmov 0  }
  0xb3   :  { %1626 = vmatprep.subr.bf16.mxu1 %v4161_v62  ;;  %v4185_v29 = vcombine.high %v468_v18, %v472_v19  ;;  %v4170_v30 = vcombine.low %v453_v14, %v457_v15  ;;  %v5449_v33 = vcombine.high %v5445_v21, %v5445_v21  ;;  %v4179_v34 = vcombine.high %v461_v23, %v465_v24  ;;  %v504_v53 = vld [vmem:[#allocation8 + $0x260] sm:$0xff]  ;;  %v497_v57 = vld [vmem:[#allocation8 + $0x228] sm:$0xff] }
  0xb4   :  { %409 = vmatmul.mubr.bf16.vlgmr.msra.gmra.mrb[0].mxu0 %v294_v5  ;;  %v4184_v35 = vcombine.low %v468_v18, %v472_v19  ;;  %v4193_v38 = vcombine.high %v476_v27, %v480_v28  ;;  %v4178_v39 = vcombine.low %v461_v23, %v465_v24  ;;  %v4187_v42 = vcombine.high %v469_v31, %v473_v32  ;;  %v508_v60 = vld [vmem:[#allocation8 + $0x280] sm:$0xff]  ;;  %v501_v1 = vld [vmem:[#allocation8 + $0x248] sm:$0xff] }
  0xb5   :  { %1705 = vmatpush1.bf16.msra.mxu0 %v4146_v4  ;;  %1654 = vmatprep.mubr.bf16.mxu1 %v5449_v33  ;;  %v4192_v43 = vcombine.low %v476_v27, %v480_v28  ;;  %v4201_v46 = vcombine.high %v484_v36, %v488_v37  ;;  %v4186_v47 = vcombine.low %v469_v31, %v473_v32  ;;  %v512_v61 = vld [vmem:[#allocation8 + $0x2a0] sm:$0xff]  ;;  %v505_v2 = vld [vmem:[#allocation8 + $0x268] sm:$0xff]  ;;  %vm3238_vm8 = vcmask 64512  }
  0xb6   :  { %1706 = vmatprep.subr.bf16.mxu0 %v4155_v6  ;;  %1627 = vmatpush1.bf16.msra.mxu1 %v4160_v7  ;;  %v4195_v50 = vcombine.high %v477_v40, %v481_v41  ;;  %v4200_v51 = vcombine.low %v484_v36, %v488_v37  ;;  %v4209_v54 = vcombine.high %v492_v44, %v496_v45  ;;  %v516_v5 = vld [vmem:[#allocation8 + $0x2c0] sm:$0xff]  ;;  %v509_v9 = vld [vmem:[#allocation8 + $0x288] sm:$0xff]  ;;  %vm3453_vm9 = vcmask 1043456  }
  0xb7   :  { %1628 = vmatprep.subr.bf16.mxu1 %v4169_v10  ;;  %1736 = vmatprep.mubr.bf16.mxu0 %v5449_v33  ;;  %v4194_v55 = vcombine.low %v477_v40, %v481_v41  ;;  %v4203_v58 = vcombine.high %v485_v48, %v489_v49  ;;  %v4208_v59 = vcombine.low %v492_v44, %v496_v45  ;;  %v520_v6 = vld [vmem:[#allocation8 + $0x2e0] sm:$0xff]  ;;  %v513_v10 = vld [vmem:[#allocation8 + $0x2a8] sm:$0xff] }
  0xb8   :  { %v4217_v62 = vcombine.high %v500_v52, %v504_v53  ;;  %v4202_v63 = vcombine.low %v485_v48, %v489_v49  ;;  %v4211_v3 = vcombine.high %v493_v56, %v497_v57  ;;  %v4216_v4 = vcombine.low %v500_v52, %v504_v53  ;;  %v528_v14 = vld [vmem:[#allocation8 + $0x320] sm:$0xff]  ;;  %v521_v18 = vld [vmem:[#allocation8 + $0x2e8] sm:$0xff] }
  0xb9   :  { %1707 = vmatpush1.bf16.msra.mxu0 %v4154_v13  ;;  %v4225_v7 = vcombine.high %v508_v60, %v512_v61  ;;  %v4210_v8 = vcombine.low %v493_v56, %v497_v57  ;;  %v4219_v11 = vcombine.high %v501_v1, %v505_v2  ;;  %v4224_v12 = vcombine.low %v508_v60, %v512_v61  ;;  %v524_v13 = vld [vmem:[#allocation8 + $0x300] sm:$0xff]  ;;  %v529_v27 = vld [vmem:[#allocation8 + $0x328] sm:$0xff] }
  0xba   :  { %1708 = vmatprep.subr.bf16.mxu0 %v4163_v16  ;;  %1629 = vmatpush1.bf16.msra.mxu1 %v4168_v17  ;;  %v4233_v15 = vcombine.high %v516_v5, %v520_v6  ;;  %v4218_v16 = vcombine.low %v501_v1, %v505_v2  ;;  %v517_v17 = vld [vmem:[#allocation8 + $0x2c8] sm:$0xff]  ;;  %v4227_v19 = vcombine.high %v509_v9, %v513_v10  ;;  %v536_v23 = vld [vmem:[#allocation8 + $0x360] sm:$0xff] }
  0xbb   :  { %1630 = vmatprep.subr.bf16.mxu1 %v4177_v20  ;;  %v4232_v20 = vcombine.low %v516_v5, %v520_v6  ;;  %v4241_v24 = vcombine.high %v524_v13, %v528_v14  ;;  %v4235_v28 = vcombine.high %v517_v17, %v521_v18  ;;  %v544_v31 = vld [vmem:[#allocation8 + $0x3a0] sm:$0xff]  ;;  %v537_v36 = vld [vmem:[#allocation8 + $0x368] sm:$0xff] }
  0xbc   :  { %v552_v40 = vld [vmem:[#allocation8 + $0x3e0] sm:$0xff]  ;;  %v545_v44 = vld [vmem:[#allocation8 + $0x3a8] sm:$0xff] }
  0xbd   :  { %1709 = vmatpush1.bf16.msra.mxu0 %v4162_v22  ;;  %v532_v22 = vld [vmem:[#allocation8 + $0x340] sm:$0xff]  ;;  %v553_v52 = vld [vmem:[#allocation8 + $0x3e8] sm:$0xff] }
  0xbe   :  { %1710 = vmatprep.subr.bf16.mxu0 %v4171_v25  ;;  %1631 = vmatpush1.bf16.msra.mxu1 %v4176_v26  ;;  %v4226_v25 = vcombine.low %v509_v9, %v513_v10  ;;  %v525_v26 = vld [vmem:[#allocation8 + $0x308] sm:$0xff]  ;;  %v4249_v32 = vcombine.high %v532_v22, %v536_v23  ;;  %v560_v48 = vld [vmem:[#allocation8 + $0x420] sm:$0xff] }
  0xbf   :  { %1632 = vmatprep.subr.bf16.mxu1 %v4185_v29  ;;  %v4240_v29 = vcombine.low %v524_v13, %v528_v14  ;;  %v4243_v37 = vcombine.high %v525_v26, %v529_v27  ;;  %v568_v56 = vld [vmem:[#allocation8 + $0x460] sm:$0xff]  ;;  %v573_v14 = vld [vmem:[#allocation8 + $0x488] sm:$0xff] }
  0xc0   :  { %v572_v2 = vld [vmem:[#allocation8 + $0x480] sm:$0xff] }
  0xc1   :  { %1711 = vmatpush1.bf16.msra.mxu0 %v4170_v30  ;;  %v540_v30 = vld [vmem:[#allocation8 + $0x380] sm:$0xff] }
  0xc2   :  { %1712 = vmatprep.subr.bf16.mxu0 %v4179_v34  ;;  %1633 = vmatpush1.bf16.msra.mxu1 %v4184_v35  ;;  %v4234_v34 = vcombine.low %v517_v17, %v521_v18  ;;  %v533_v35 = vld [vmem:[#allocation8 + $0x348] sm:$0xff]  ;;  %v4257_v41 = vcombine.high %v540_v30, %v544_v31  ;;  %v580_v9 = vld [vmem:[#allocation8 + $0x4c0] sm:$0xff] }
  0xc3   :  { %1634 = vmatprep.subr.bf16.mxu1 %v4193_v38  ;;  %v4248_v38 = vcombine.low %v532_v22, %v536_v23  ;;  %v4251_v45 = vcombine.high %v533_v35, %v537_v36  ;;  %v584_v10 = vld [vmem:[#allocation8 + $0x4e0] sm:$0xff]  ;;  %v581_v23 = vld [vmem:[#allocation8 + $0x4c8] sm:$0xff] }
  0xc4   :  { %v588_v17 = vld [vmem:[#allocation8 + $0x500] sm:$0xff]  ;;  %v4296_v22 = vcombine.low %v580_v9, %v584_v10 }
  0xc5   :  { %1713 = vmatpush1.bf16.msra.mxu0 %v4178_v39  ;;  %v548_v39 = vld [vmem:[#allocation8 + $0x3c0] sm:$0xff] }
  0xc6   :  { %1714 = vmatprep.subr.bf16.mxu0 %v4187_v42  ;;  %1635 = vmatpush1.bf16.msra.mxu1 %v4192_v43  ;;  %v4242_v42 = vcombine.low %v525_v26, %v529_v27  ;;  %v541_v43 = vld [vmem:[#allocation8 + $0x388] sm:$0xff]  ;;  %v4265_v49 = vcombine.high %v548_v39, %v552_v40  ;;  %v592_v18 = vld [vmem:[#allocation8 + $0x520] sm:$0xff] }
  0xc7   :  { %1636 = vmatprep.subr.bf16.mxu1 %v4201_v46  ;;  %v4256_v46 = vcombine.low %v540_v30, %v544_v31  ;;  %v4259_v53 = vcombine.high %v541_v43, %v545_v44  ;;  %v593_v30 = vld [vmem:[#allocation8 + $0x528] sm:$0xff] }
  0xc9   :  { %1715 = vmatpush1.bf16.msra.mxu0 %v4186_v47  ;;  %v556_v47 = vld [vmem:[#allocation8 + $0x400] sm:$0xff] }
  0xca   :  { %1716 = vmatprep.subr.bf16.mxu0 %v4195_v50  ;;  %1637 = vmatpush1.bf16.msra.mxu1 %v4200_v51  ;;  %v4250_v50 = vcombine.low %v533_v35, %v537_v36  ;;  %v549_v51 = vld [vmem:[#allocation8 + $0x3c8] sm:$0xff]  ;;  %v4273_v57 = vcombine.high %v556_v47, %v560_v48  ;;  %v4272_v61 = vcombine.low %v556_v47, %v560_v48  ;;  %v596_v35 = vld [vmem:[#allocation8 + $0x540] sm:$0xff] }
  0xcb   :  { %1638 = vmatprep.subr.bf16.mxu1 %v4209_v54  ;;  %v4264_v54 = vcombine.low %v548_v39, %v552_v40  ;;  %v4267_v60 = vcombine.high %v549_v51, %v553_v52  ;;  %v600_v36 = vld [vmem:[#allocation8 + $0x560] sm:$0xff]  ;;  %v601_v39 = vld [vmem:[#allocation8 + $0x568] sm:$0xff] }
  0xcc   :  { %v4312_v40 = vcombine.low %v596_v35, %v600_v36  ;;  %v609_v47 = vld [vmem:[#allocation8 + $0x5a8] sm:$0xff] }
  0xcd   :  { %1717 = vmatpush1.bf16.msra.mxu0 %v4194_v55  ;;  %v564_v55 = vld [vmem:[#allocation8 + $0x440] sm:$0xff] }
  0xce   :  { %1718 = vmatprep.subr.bf16.mxu0 %v4203_v58  ;;  %1639 = vmatpush1.bf16.msra.mxu1 %v4208_v59  ;;  %v4258_v58 = vcombine.low %v541_v43, %v545_v44  ;;  %v5455_v59 = vcombine.low %v5445_v21, %v5445_v21  ;;  %v4281_v1 = vcombine.high %v564_v55, %v568_v56  ;;  %v565_v21 = vld [vmem:[#allocation8 + $0x448] sm:$0xff]  ;;  %v604_v43 = vld [vmem:[#allocation8 + $0x580] sm:$0xff] }
  0xcf   :  { %1640 = vmatprep.subr.bf16.mxu1 %v4217_v62  ;;  %v557_v62 = vld [vmem:[#allocation8 + $0x408] sm:$0xff]  ;;  %v4280_v6 = vcombine.low %v564_v55, %v568_v56  ;;  %v608_v44 = vld [vmem:[#allocation8 + $0x5a0] sm:$0xff] }
  0xd0   :  { %v4320_v48 = vcombine.low %v604_v43, %v608_v44  ;;  %v617_v55 = vld [vmem:[#allocation8 + $0x5e8] sm:$0xff] }
  0xd1   :  { %1719 = vmatpush1.bf16.msra.mxu0 %v4202_v63  ;;  %v561_v63 = vld [vmem:[#allocation8 + $0x428] sm:$0xff] }
  0xd2   :  { %1720 = vmatprep.subr.bf16.mxu0 %v4211_v3  ;;  %1641 = vmatpush1.bf16.msra.mxu1 %v4216_v4  ;;  %v576_v3 = vld [vmem:[#allocation8 + $0x4a0] sm:$0xff]  ;;  %v4266_v4 = vcombine.low %v549_v51, %v553_v52  ;;  %v4275_v5 = vcombine.high %v557_v62, %v561_v63 }
  0xd3   :  { %1642 = vmatprep.subr.bf16.mxu1 %v4225_v7  ;;  %v569_v7 = vld [vmem:[#allocation8 + $0x468] sm:$0xff]  ;;  %v4288_v13 = vcombine.low %v572_v2, %v576_v3  ;;  %v612_v51 = vld [vmem:[#allocation8 + $0x5c0] sm:$0xff] }
  0xd4   :  { %v616_v52 = vld [vmem:[#allocation8 + $0x5e0] sm:$0xff] }
  0xd5   :  { %1721 = vmatpush1.bf16.msra.mxu0 %v4210_v8  ;;  %v4289_v8 = vcombine.high %v572_v2, %v576_v3  ;;  %v4328_v56 = vcombine.low %v612_v51, %v616_v52 }
  0xd6   :  { %1722 = vmatprep.subr.bf16.mxu0 %v4219_v11  ;;  %1643 = vmatpush1.bf16.msra.mxu1 %v4224_v12  ;;  %v4274_v11 = vcombine.low %v557_v62, %v561_v63  ;;  %v4283_v12 = vcombine.high %v565_v21, %v569_v7  ;;  %v431_v62 = vld [vmem:[#allocation8 + $0x18] sm:$0xff] }
  0xd7   :  { %1644 = vmatprep.subr.bf16.mxu1 %v4233_v15  ;;  %v577_v15 = vld [vmem:[#allocation8 + $0x4a8] sm:$0xff] }
  0xd8   :  { %v4290_v26 = vcombine.low %v573_v14, %v577_v15 }
  0xd9   :  { %1723 = vmatpush1.bf16.msra.mxu0 %v4218_v16  ;;  %v4297_v16 = vcombine.high %v580_v9, %v584_v10 }
  0xda   :  { %1724 = vmatprep.subr.bf16.mxu0 %v4227_v19  ;;  %1645 = vmatpush1.bf16.msra.mxu1 %v4232_v20  ;;  %v4282_v19 = vcombine.low %v565_v21, %v569_v7  ;;  %v4291_v20 = vcombine.high %v573_v14, %v577_v15  ;;  %v5470_v7 = vld [vmem:[%s5747_s3] sm:$0x3]  ;;  %v438_v14 = vld [vmem:[#allocation8 + $0x50] sm:$0xff] }
  0xdb   :  { %1646 = vmatprep.subr.bf16.mxu1 %v4241_v24  ;;  %v585_v24 = vld [vmem:[#allocation8 + $0x4e8] sm:$0xff]  ;;  %v442_v15 = vld [vmem:[#allocation8 + $0x70] sm:$0xff] }
  0xdc   :  { %v4299_v27 = vcombine.high %v581_v23, %v585_v24  ;;  %v4298_v31 = vcombine.low %v581_v23, %v585_v24  ;;  %v446_v23 = vld [vmem:[#allocation8 + $0x90] sm:$0xff] }
  0xdd   :  { %1725 = vmatpush1.bf16.msra.mxu0 %v4226_v25  ;;  %v4305_v25 = vcombine.high %v588_v17, %v592_v18  ;;  %v450_v24 = vld [vmem:[#allocation8 + $0xb0] sm:$0xff] }
  0xde   :  { %1726 = vmatprep.subr.bf16.mxu0 %v4235_v28  ;;  %1647 = vmatpush1.bf16.msra.mxu1 %v4240_v29  ;;  %v4304_v28 = vcombine.low %v588_v17, %v592_v18  ;;  %v589_v29 = vld [vmem:[#allocation8 + $0x508] sm:$0xff]  ;;  %v443_v17 = vld [vmem:[#allocation8 + $0x78] sm:$0xff] }
  0xdf   :  { %1648 = vmatprep.subr.bf16.mxu1 %v4249_v32  ;;  %v4307_v32 = vcombine.high %v589_v29, %v593_v30 }
  0xe1   :  { %1727 = vmatpush1.bf16.msra.mxu0 %v4234_v34  ;;  %v4306_v34 = vcombine.low %v589_v29, %v593_v30  ;;  %v4165_v29 = vcombine.high %v446_v23, %v450_v24 }
  0xe2   :  { %1728 = vmatprep.subr.bf16.mxu0 %v4243_v37  ;;  %1649 = vmatpush1.bf16.msra.mxu1 %v4248_v38  ;;  %v597_v37 = vld [vmem:[#allocation8 + $0x548] sm:$0xff]  ;;  %v4313_v38 = vcombine.high %v596_v35, %v600_v36  ;;  %v459_v35 = vld [vmem:[#allocation8 + $0xf8] sm:$0xff]  ;;  %v4164_v36 = vcombine.low %v446_v23, %v450_v24  ;;  %v502_v23 = vld [vmem:[#allocation8 + $0x250] sm:$0xff] }
  0xe3   :  { %1650 = vmatprep.subr.bf16.mxu1 %v4257_v41  ;;  %v4314_v41 = vcombine.low %v597_v37, %v601_v39  ;;  %v506_v24 = vld [vmem:[#allocation8 + $0x270] sm:$0xff] }
  0xe5   :  { %1729 = vmatpush1.bf16.msra.mxu0 %v4242_v42  ;;  %v4315_v42 = vcombine.high %v597_v37, %v601_v39 }
  0xe6   :  { %1730 = vmatprep.subr.bf16.mxu0 %v4251_v45  ;;  %1651 = vmatpush1.bf16.msra.mxu1 %v4256_v46  ;;  %v605_v45 = vld [vmem:[#allocation8 + $0x588] sm:$0xff]  ;;  %v4321_v46 = vcombine.high %v604_v43, %v608_v44  ;;  %v467_v43 = vld [vmem:[#allocation8 + $0x138] sm:$0xff] }
  0xe7   :  { %1652 = vmatprep.subr.bf16.mxu1 %v4265_v49  ;;  %v4322_v49 = vcombine.low %v605_v45, %v609_v47 }
  0xe9   :  { %1731 = vmatpush1.bf16.msra.mxu0 %v4250_v50  ;;  %v4323_v50 = vcombine.high %v605_v45, %v609_v47  ;;  %v470_v47 = vld [vmem:[#allocation8 + $0x150] sm:$0xff] }
  0xea   :  { %1732 = vmatprep.subr.bf16.mxu0 %v4259_v53  ;;  %1653 = vmatpush1.bf16.msra.mxu1 %v4264_v54  ;;  %v613_v53 = vld [vmem:[#allocation8 + $0x5c8] sm:$0xff]  ;;  %v4329_v54 = vcombine.high %v612_v51, %v616_v52 }
  0xeb   :  { %1663 = vmatprep.subr.bf16.mxu1 %v4273_v57  ;;  %v4330_v57 = vcombine.low %v613_v53, %v617_v55 }
  0xed   :  { %1733 = vmatpush1.bf16.msra.mxu0 %v4258_v58  ;;  %1655 = vmatmul.mubr.bf16.vlgmr.msra.gmra.mrb[0].mxu1 %v5455_v59  ;;  %v4331_v58 = vcombine.high %v613_v53, %v617_v55  ;;  %v478_v55 = vld [vmem:[#allocation8 + $0x190] sm:$0xff] }
  0xee   :  { %1734 = vmatprep.subr.bf16.mxu0 %v4267_v60  ;;  %1664 = vmatpush1.bf16.msra.mxu1 %v4272_v61  ;;  %v430_v60 = vld [vmem:[#allocation8 + $0x10] sm:$0xff] }
  0xef   :  { %1665 = vmatprep.subr.bf16.mxu1 %v4281_v1  ;;  %1695 = vmatprep.mubr.bf16.mxu1 %v5226_v0  ;;  %v434_v61 = vld [vmem:[#allocation8 + $0x30] sm:$0xff]  ;;  %v435_v1 = vld [vmem:[#allocation8 + $0x38] sm:$0xff] }
  0xf0   :  { %v4149_v63 = vcombine.high %v430_v60, %v434_v61  ;;  %v4148_v2 = vcombine.low %v430_v60, %v434_v61  ;;  %v4150_v3 = vcombine.low %v431_v62, %v435_v1 }
  0xf1   :  { %1735 = vmatpush1.bf16.msra.mxu0 %v4266_v4  ;;  %v4151_v4 = vcombine.high %v431_v62, %v435_v1  ;;  %v486_v1 = vld [vmem:[#allocation8 + $0x1d0] sm:$0xff] }
  0xf2   :  { %1745 = vmatprep.subr.bf16.mxu0 %v4275_v5  ;;  %1666 = vmatpush1.bf16.msra.mxu1 %v4280_v6  ;;  %v254_v5 = vlaneseq }
  0xf3   :  { %1667 = vmatprep.subr.bf16.mxu1 %v4289_v8 }
  0xf4   :  { %1737 = vmatmul.mubr.bf16.vlgmr.msra.gmra.mrb[4].mxu0 %v5455_v59  ;;  %v5462_v6 = vshrl.u32 %v254_v5, 7 }
  0xf5   :  { %1746 = vmatpush1.bf16.msra.mxu0 %v4274_v11  ;;  %1777 = vmatprep.mubr.bf16.mxu0 %v5226_v0 }
  0xf6   :  { %1747 = vmatprep.subr.bf16.mxu0 %v4283_v12  ;;  %1668 = vmatpush1.bf16.msra.mxu1 %v4288_v13  ;;  %v5465_v21 = vsub.s32 0, %v5462_v6 }
  0xf7   :  { %1669 = vmatprep.subr.bf16.mxu1 %v4297_v16  ;;  %v439_v16 = vld [vmem:[#allocation8 + $0x58] sm:$0xff] }
  0xf8   :  { %v257_v8 = vrot.slane %v5470_v7, %v5465_v21 }
  0xf9   :  { %1748 = vmatpush1.bf16.msra.mxu0 %v4282_v19 }
  0xfa   :  { %1749 = vmatprep.subr.bf16.mxu0 %v4291_v20  ;;  %1670 = vmatpush1.bf16.msra.mxu1 %v4296_v22  ;;  %v4157_v20 = vcombine.high %v438_v14, %v442_v15  ;;  %v4159_v22 = vcombine.high %v439_v16, %v443_v17 }
  0xfb   :  { %1671 = vmatprep.subr.bf16.mxu1 %v4305_v25  ;;  %v447_v25 = vld [vmem:[#allocation8 + $0x98] sm:$0xff] }
  0xfd   :  { %1750 = vmatpush1.bf16.msra.mxu0 %v4290_v26  ;;  %v451_v26 = vld [vmem:[#allocation8 + $0xb8] sm:$0xff] }
  0xfe   :  { %1751 = vmatprep.subr.bf16.mxu0 %v4299_v27  ;;  %1672 = vmatpush1.bf16.msra.mxu1 %v4304_v28  ;;  %v4156_v27 = vcombine.low %v438_v14, %v442_v15  ;;  %v4158_v28 = vcombine.low %v439_v16, %v443_v17  ;;  %v4167_v30 = vcombine.high %v447_v25, %v451_v26  ;;  %v498_v14 = vld [vmem:[#allocation8 + $0x230] sm:$0xff]  ;;  %v495_v15 = vld [vmem:[#allocation8 + $0x218] sm:$0xff] }
  0xff   :  { %1673 = vmatprep.subr.bf16.mxu1 %v4313_v38  ;;  %v4166_v37 = vcombine.low %v447_v25, %v451_v26  ;;  %v499_v16 = vld [vmem:[#allocation8 + $0x238] sm:$0xff] }
 0x100   :  { %v503_v25 = vld [vmem:[#allocation8 + $0x258] sm:$0xff] }
 0x101   :  { %1752 = vmatpush1.bf16.msra.mxu0 %v4298_v31  ;;  %v454_v31 = vld [vmem:[#allocation8 + $0xd0] sm:$0xff]  ;;  %v507_v26 = vld [vmem:[#allocation8 + $0x278] sm:$0xff] }
 0x102   :  { %1753 = vmatprep.subr.bf16.mxu0 %v4307_v32  ;;  %1674 = vmatpush1.bf16.msra.mxu1 %v4312_v40  ;;  %v458_v32 = vld [vmem:[#allocation8 + $0xf0] sm:$0xff] }
 0x103   :  { %1675 = vmatprep.subr.bf16.mxu1 %v4321_v46  ;;  %v4173_v38 = vcombine.high %v454_v31, %v458_v32  ;;  %v462_v40 = vld [vmem:[#allocation8 + $0x110] sm:$0xff]  ;;  %v4172_v44 = vcombine.low %v454_v31, %v458_v32 }
 0x104   :  { %v510_v31 = vld [vmem:[#allocation8 + $0x290] sm:$0xff] }
 0x105   :  { %1754 = vmatpush1.bf16.msra.mxu0 %v4306_v34  ;;  %v455_v34 = vld [vmem:[#allocation8 + $0xd8] sm:$0xff]  ;;  %v514_v32 = vld [vmem:[#allocation8 + $0x2b0] sm:$0xff] }
 0x106   :  { %1755 = vmatprep.subr.bf16.mxu0 %v4315_v42  ;;  %1676 = vmatpush1.bf16.msra.mxu1 %v4320_v48  ;;  %v4175_v39 = vcombine.high %v455_v34, %v459_v35  ;;  %v463_v42 = vld [vmem:[#allocation8 + $0x118] sm:$0xff]  ;;  %v4174_v45 = vcombine.low %v455_v34, %v459_v35  ;;  %v474_v48 = vld [vmem:[#allocation8 + $0x170] sm:$0xff] }
 0x107   :  { %1677 = vmatprep.subr.bf16.mxu1 %v4329_v54  ;;  %v4182_v52 = vcombine.low %v463_v42, %v467_v43  ;;  %v4189_v53 = vcombine.high %v470_v47, %v474_v48  ;;  %v4188_v60 = vcombine.low %v470_v47, %v474_v48  ;;  %v511_v34 = vld [vmem:[#allocation8 + $0x298] sm:$0xff]  ;;  %v526_v47 = vld [vmem:[#allocation8 + $0x310] sm:$0xff] }
 0x108   :  { %v515_v35 = vld [vmem:[#allocation8 + $0x2b8] sm:$0xff]  ;;  %v530_v48 = vld [vmem:[#allocation8 + $0x330] sm:$0xff] }
 0x109   :  { %1756 = vmatpush1.bf16.msra.mxu0 %v4314_v41  ;;  %v466_v41 = vld [vmem:[#allocation8 + $0x130] sm:$0xff] }
 0x10a   :  { %1757 = vmatprep.subr.bf16.mxu0 %v4323_v50  ;;  %1678 = vmatpush1.bf16.msra.mxu1 %v4328_v56  ;;  %v4181_v46 = vcombine.high %v462_v40, %v466_v41  ;;  %v475_v50 = vld [vmem:[#allocation8 + $0x178] sm:$0xff]  ;;  %v4180_v51 = vcombine.low %v462_v40, %v466_v41  ;;  %v482_v56 = vld [vmem:[#allocation8 + $0x1b0] sm:$0xff] }
 0x10b   :  { %1786 = vmatprep.subr.bf16.mxu1 %v4149_v63  ;;  %v4197_v62 = vcombine.high %v478_v55, %v482_v56  ;;  %v518_v40 = vld [vmem:[#allocation8 + $0x2d0] sm:$0xff] }
 0x10c   :  { %v522_v41 = vld [vmem:[#allocation8 + $0x2f0] sm:$0xff] }
 0x10d   :  { %1758 = vmatpush1.bf16.msra.mxu0 %v4322_v49  ;;  %v471_v49 = vld [vmem:[#allocation8 + $0x158] sm:$0xff] }
 0x10e   :  { %1759 = vmatprep.subr.bf16.mxu0 %v4331_v58  ;;  %v4191_v54 = vcombine.high %v471_v49, %v475_v50  ;;  %v483_v58 = vld [vmem:[#allocation8 + $0x1b8] sm:$0xff]  ;;  %v4190_v61 = vcombine.low %v471_v49, %v475_v50 }
 0x10f   :  { %v527_v49 = vld [vmem:[#allocation8 + $0x318] sm:$0xff] }
 0x110   :  { %v531_v50 = vld [vmem:[#allocation8 + $0x338] sm:$0xff] }
 0x111   :  { %1760 = vmatpush1.bf16.msra.mxu0 %v4330_v57  ;;  %v479_v57 = vld [vmem:[#allocation8 + $0x198] sm:$0xff] }
 0x112   :  { %1868 = vmatprep.subr.bf16.mxu0 %v4151_v4  ;;  %v4199_v63 = vcombine.high %v479_v57, %v483_v58  ;;  %v491_v4 = vld [vmem:[#allocation8 + $0x1f8] sm:$0xff] }
 0x187   :  { %v410_v9 = vpop.f32.mrb[0].mxu0 }
 0x188   :  { %v411_v10 = vadd.f32 %v410_v9, %v257_v8  ;;  %v5474_v11 = vpop.f32.mrb[1].mxu0  ;;  %v4196_v8 = vcombine.low %v478_v55, %v482_v56  ;;  %v4198_v9 = vcombine.low %v479_v57, %v483_v58  ;;  %v534_v55 = vld [vmem:[#allocation8 + $0x350] sm:$0xff]  ;;  %v535_v57 = vld [vmem:[#allocation8 + $0x358] sm:$0xff] }
 0x189   :  { %v414_v12 = vpop.f32.mrb[2].mxu0  ;;  %v538_v56 = vld [vmem:[#allocation8 + $0x370] sm:$0xff]  ;;  %v539_v58 = vld [vmem:[#allocation8 + $0x378] sm:$0xff] }
 0x18a   :  { %4904 = vtanh.f32 %v411_v10  ;;  %v415_v13 = vpop.f32.mrb[3].mxu0 }
 0x18b   :  { %v494_v13 = vld [vmem:[#allocation8 + $0x210] sm:$0xff] }
 0x194   :  { %v4905_v18 = vpop.eup %4904 }
 0x195   :  { %v5476_v19 = vpack.c.bf16 %v4905_v18, %v4905_v18 }
 0x197   :  { %1696 = vmatmul.mubr.bf16.vlgmr.msra.gmra.mrb[0].mxu1 %v5476_v19  ;;  %1778 = vmatmul.mubr.bf16.vlgmr.msra.gmra.mrb[4].mxu0 %v5476_v19 }
 0x198   :  { %1787 = vmatpush1.bf16.msra.mxu1 %v4148_v2  ;;  %1869 = vmatpush1.bf16.msra.mxu0 %v4150_v3  ;;  %v490_v2 = vld [vmem:[#allocation8 + $0x1f0] sm:$0xff]  ;;  %v487_v3 = vld [vmem:[#allocation8 + $0x1d8] sm:$0xff] }
 0x199   :  { %1788 = vmatprep.subr.bf16.mxu1 %v4157_v20  ;;  %1870 = vmatprep.subr.bf16.mxu0 %v4159_v22  ;;  %v4205_v10 = vcombine.high %v486_v1, %v490_v2  ;;  %v4207_v12 = vcombine.high %v487_v3, %v491_v4  ;;  %v4204_v17 = vcombine.low %v486_v1, %v490_v2  ;;  %v542_v1 = vld [vmem:[#allocation8 + $0x390] sm:$0xff] }
 0x19a   :  { %1818 = vmatprep.mubr.bf16.mxu1 %v5449_v33  ;;  %1900 = vmatprep.mubr.bf16.mxu0 %v5449_v33  ;;  %v4183_v33 = vcombine.high %v463_v42, %v467_v43  ;;  %v4206_v18 = vcombine.low %v487_v3, %v491_v4  ;;  %v4213_v20 = vcombine.high %v494_v13, %v498_v14  ;;  %v519_v42 = vld [vmem:[#allocation8 + $0x2d8] sm:$0xff]  ;;  %v546_v2 = vld [vmem:[#allocation8 + $0x3b0] sm:$0xff] }
 0x19b   :  { %v4215_v22 = vcombine.high %v495_v15, %v499_v16  ;;  %v523_v43 = vld [vmem:[#allocation8 + $0x2f8] sm:$0xff] }
 0x19c   :  { %1789 = vmatpush1.bf16.msra.mxu1 %v4156_v27  ;;  %1871 = vmatpush1.bf16.msra.mxu0 %v4158_v28  ;;  %v4212_v27 = vcombine.low %v494_v13, %v498_v14  ;;  %v4214_v28 = vcombine.low %v495_v15, %v499_v16  ;;  %v543_v3 = vld [vmem:[#allocation8 + $0x398] sm:$0xff]  ;;  %v550_v13 = vld [vmem:[#allocation8 + $0x3d0] sm:$0xff] }
 0x19d   :  { %1790 = vmatprep.subr.bf16.mxu1 %v4165_v29  ;;  %1872 = vmatprep.subr.bf16.mxu0 %v4167_v30  ;;  %v4221_v29 = vcombine.high %v502_v23, %v506_v24  ;;  %v4223_v30 = vcombine.high %v503_v25, %v507_v26  ;;  %v547_v4 = vld [vmem:[#allocation8 + $0x3b8] sm:$0xff]  ;;  %v554_v14 = vld [vmem:[#allocation8 + $0x3f0] sm:$0xff] }
 0x19e   :  { %v551_v15 = vld [vmem:[#allocation8 + $0x3d8] sm:$0xff] }
 0x19f   :  { %v555_v16 = vld [vmem:[#allocation8 + $0x3f8] sm:$0xff] }
 0x1a0   :  { %1791 = vmatpush1.bf16.msra.mxu1 %v4164_v36  ;;  %1873 = vmatpush1.bf16.msra.mxu0 %v4166_v37  ;;  %v4220_v36 = vcombine.low %v502_v23, %v506_v24  ;;  %v4222_v37 = vcombine.low %v503_v25, %v507_v26  ;;  %v558_v23 = vld [vmem:[#allocation8 + $0x410] sm:$0xff]  ;;  %v559_v25 = vld [vmem:[#allocation8 + $0x418] sm:$0xff] }
 0x1a1   :  { %1792 = vmatprep.subr.bf16.mxu1 %v4173_v38  ;;  %1874 = vmatprep.subr.bf16.mxu0 %v4175_v39  ;;  %v4229_v38 = vcombine.high %v510_v31, %v514_v32  ;;  %v4231_v39 = vcombine.high %v511_v34, %v515_v35  ;;  %v562_v24 = vld [vmem:[#allocation8 + $0x430] sm:$0xff]  ;;  %v563_v26 = vld [vmem:[#allocation8 + $0x438] sm:$0xff] }
 0x1a4   :  { %1793 = vmatpush1.bf16.msra.mxu1 %v4172_v44  ;;  %1875 = vmatpush1.bf16.msra.mxu0 %v4174_v45  ;;  %v4228_v44 = vcombine.low %v510_v31, %v514_v32  ;;  %v4230_v45 = vcombine.low %v511_v34, %v515_v35  ;;  %v566_v31 = vld [vmem:[#allocation8 + $0x450] sm:$0xff]  ;;  %v567_v34 = vld [vmem:[#allocation8 + $0x458] sm:$0xff] }
 0x1a5   :  { %1794 = vmatprep.subr.bf16.mxu1 %v4181_v46  ;;  %1876 = vmatprep.subr.bf16.mxu0 %v4183_v33  ;;  %v4237_v46 = vcombine.high %v518_v40, %v522_v41  ;;  %v4239_v33 = vcombine.high %v519_v42, %v523_v43  ;;  %v570_v32 = vld [vmem:[#allocation8 + $0x470] sm:$0xff]  ;;  %v571_v35 = vld [vmem:[#allocation8 + $0x478] sm:$0xff] }
 0x1a8   :  { %1795 = vmatpush1.bf16.msra.mxu1 %v4180_v51  ;;  %1877 = vmatpush1.bf16.msra.mxu0 %v4182_v52  ;;  %v4236_v51 = vcombine.low %v518_v40, %v522_v41  ;;  %v4238_v52 = vcombine.low %v519_v42, %v523_v43  ;;  %v574_v40 = vld [vmem:[#allocation8 + $0x490] sm:$0xff]  ;;  %v575_v42 = vld [vmem:[#allocation8 + $0x498] sm:$0xff] }
 0x1a9   :  { %1796 = vmatprep.subr.bf16.mxu1 %v4189_v53  ;;  %1878 = vmatprep.subr.bf16.mxu0 %v4191_v54  ;;  %v4245_v53 = vcombine.high %v526_v47, %v530_v48  ;;  %v4247_v54 = vcombine.high %v527_v49, %v531_v50  ;;  %v578_v41 = vld [vmem:[#allocation8 + $0x4b0] sm:$0xff]  ;;  %v579_v43 = vld [vmem:[#allocation8 + $0x4b8] sm:$0xff] }
 0x1ac   :  { %1797 = vmatpush1.bf16.msra.mxu1 %v4188_v60  ;;  %1879 = vmatpush1.bf16.msra.mxu0 %v4190_v61  ;;  %v4244_v60 = vcombine.low %v526_v47, %v530_v48  ;;  %v4246_v61 = vcombine.low %v527_v49, %v531_v50  ;;  %v582_v47 = vld [vmem:[#allocation8 + $0x4d0] sm:$0xff]  ;;  %v583_v49 = vld [vmem:[#allocation8 + $0x4d8] sm:$0xff] }
 0x1ad   :  { %1798 = vmatprep.subr.bf16.mxu1 %v4197_v62  ;;  %1880 = vmatprep.subr.bf16.mxu0 %v4199_v63  ;;  %v4253_v62 = vcombine.high %v534_v55, %v538_v56  ;;  %v4255_v63 = vcombine.high %v535_v57, %v539_v58  ;;  %v586_v48 = vld [vmem:[#allocation8 + $0x4f0] sm:$0xff]  ;;  %v587_v50 = vld [vmem:[#allocation8 + $0x4f8] sm:$0xff] }
 0x1b0   :  { %1799 = vmatpush1.bf16.msra.mxu1 %v4196_v8  ;;  %1881 = vmatpush1.bf16.msra.mxu0 %v4198_v9  ;;  %v4252_v8 = vcombine.low %v534_v55, %v538_v56  ;;  %v4254_v9 = vcombine.low %v535_v57, %v539_v58  ;;  %v594_v55 = vld [vmem:[#allocation8 + $0x530] sm:$0xff]  ;;  %v591_v56 = vld [vmem:[#allocation8 + $0x518] sm:$0xff]  ;;  %v4300_v58 = vcombine.low %v582_v47, %v586_v48 }
 0x1b1   :  { %1800 = vmatprep.subr.bf16.mxu1 %v4205_v10  ;;  %1882 = vmatprep.subr.bf16.mxu0 %v4207_v12  ;;  %v4261_v10 = vcombine.high %v542_v1, %v546_v2  ;;  %v4263_v12 = vcombine.high %v543_v3, %v547_v4  ;;  %v595_v57 = vld [vmem:[#allocation8 + $0x538] sm:$0xff] }
 0x1b4   :  { %1801 = vmatpush1.bf16.msra.mxu1 %v4204_v17  ;;  %1883 = vmatpush1.bf16.msra.mxu0 %v4206_v18  ;;  %v4260_v17 = vcombine.low %v542_v1, %v546_v2  ;;  %v4262_v18 = vcombine.low %v543_v3, %v547_v4  ;;  %v602_v1 = vld [vmem:[#allocation8 + $0x570] sm:$0xff]  ;;  %v599_v2 = vld [vmem:[#allocation8 + $0x558] sm:$0xff] }
 0x1b5   :  { %1802 = vmatprep.subr.bf16.mxu1 %v4213_v20  ;;  %1884 = vmatprep.subr.bf16.mxu0 %v4215_v22  ;;  %v4269_v20 = vcombine.high %v550_v13, %v554_v14  ;;  %v4271_v22 = vcombine.high %v551_v15, %v555_v16  ;;  %v603_v3 = vld [vmem:[#allocation8 + $0x578] sm:$0xff] }
 0x1b8   :  { %1803 = vmatpush1.bf16.msra.mxu1 %v4212_v27  ;;  %1885 = vmatpush1.bf16.msra.mxu0 %v4214_v28  ;;  %v4268_v27 = vcombine.low %v550_v13, %v554_v14  ;;  %v4270_v28 = vcombine.low %v551_v15, %v555_v16  ;;  %v610_v13 = vld [vmem:[#allocation8 + $0x5b0] sm:$0xff]  ;;  %v607_v14 = vld [vmem:[#allocation8 + $0x598] sm:$0xff] }
 0x1b9   :  { %1804 = vmatprep.subr.bf16.mxu1 %v4221_v29  ;;  %1886 = vmatprep.subr.bf16.mxu0 %v4223_v30  ;;  %v4277_v29 = vcombine.high %v558_v23, %v562_v24  ;;  %v4279_v30 = vcombine.high %v559_v25, %v563_v26  ;;  %v611_v15 = vld [vmem:[#allocation8 + $0x5b8] sm:$0xff] }
 0x1bc   :  { %1805 = vmatpush1.bf16.msra.mxu1 %v4220_v36  ;;  %1887 = vmatpush1.bf16.msra.mxu0 %v4222_v37  ;;  %v4276_v36 = vcombine.low %v558_v23, %v562_v24  ;;  %v4278_v37 = vcombine.low %v559_v25, %v563_v26  ;;  %v618_v23 = vld [vmem:[#allocation8 + $0x5f0] sm:$0xff]  ;;  %v615_v24 = vld [vmem:[#allocation8 + $0x5d8] sm:$0xff] }
 0x1bd   :  { %1806 = vmatprep.subr.bf16.mxu1 %v4229_v38  ;;  %1888 = vmatprep.subr.bf16.mxu0 %v4231_v39  ;;  %v4285_v38 = vcombine.high %v566_v31, %v570_v32  ;;  %v4287_v39 = vcombine.high %v567_v34, %v571_v35  ;;  %v619_v25 = vld [vmem:[#allocation8 + $0x5f8] sm:$0xff] }
 0x1c0   :  { %1807 = vmatpush1.bf16.msra.mxu1 %v4228_v44  ;;  %1889 = vmatpush1.bf16.msra.mxu0 %v4230_v45  ;;  %v4284_v44 = vcombine.low %v566_v31, %v570_v32  ;;  %v4286_v45 = vcombine.low %v567_v34, %v571_v35  ;;  %v4334_v31 = vcombine.low %v615_v24, %v619_v25  ;;  %v4724_v32 = vld [vmem:[#allocation10] ss:$16 sps:$4 sm:$0xff]   ;;  %v4726_v34 = vld [vmem:[#allocation10 + $0x4] ss:$16 sps:$4 sm:$0xff]   ;;  %v4727_v35 = vld [vmem:[#allocation10 + $0x8] ss:$16 sps:$4 sm:$0xff]  }
 0x1c1   :  { %1808 = vmatprep.subr.bf16.mxu1 %v4237_v46  ;;  %1890 = vmatprep.subr.bf16.mxu0 %v4239_v33  ;;  %v4293_v46 = vcombine.high %v574_v40, %v578_v41  ;;  %v4295_v33 = vcombine.high %v575_v42, %v579_v43 }
 0x1c4   :  { %1809 = vmatpush1.bf16.msra.mxu1 %v4236_v51  ;;  %1891 = vmatpush1.bf16.msra.mxu0 %v4238_v52  ;;  %v4292_v51 = vcombine.low %v574_v40, %v578_v41  ;;  %v4301_v52 = vcombine.high %v582_v47, %v586_v48  ;;  %v4733_v40 = vld [vmem:[#allocation10 + $0x28] ss:$16 sps:$4 sm:$0xff]   ;;  %v4738_v41 = vld [vmem:[#allocation10 + $0x44] ss:$16 sps:$4 sm:$0xff]  }
 0x1c5   :  { %1810 = vmatprep.subr.bf16.mxu1 %v4245_v53  ;;  %1892 = vmatprep.subr.bf16.mxu0 %v4247_v54  ;;  %v4303_v53 = vcombine.high %v583_v49, %v587_v50  ;;  %v590_v54 = vld [vmem:[#allocation8 + $0x510] sm:$0xff]  ;;  %v4745_v47 = vld [vmem:[#allocation10 + $0x68] ss:$16 sps:$4 sm:$0xff]  }
 0x1c6   :  { %v4308_v4 = vcombine.low %v590_v54, %v594_v55  ;;  %v4750_v48 = vld [vmem:[#allocation10 + $0x84] ss:$16 sps:$4 sm:$0xff]  }
 0x1c8   :  { %1811 = vmatpush1.bf16.msra.mxu1 %v4244_v60  ;;  %1893 = vmatpush1.bf16.msra.mxu0 %v4246_v61  ;;  %v4302_v60 = vcombine.low %v583_v49, %v587_v50  ;;  %v4309_v61 = vcombine.high %v590_v54, %v594_v55  ;;  %v4753_v49 = vld [vmem:[#allocation10 + $0x8c] ss:$16 sps:$4 sm:$0xff]   ;;  %v4748_v50 = vld [vmem:[#allocation10 + $0x80] ss:$16 sps:$4 sm:$0xff]   ;;  %v4757_v54 = vld [vmem:[#allocation10 + $0xa8] ss:$16 sps:$4 sm:$0xff]  }
 0x1c9   :  { %1812 = vmatprep.subr.bf16.mxu1 %v4253_v62  ;;  %1894 = vmatprep.subr.bf16.mxu0 %v4255_v63  ;;  %v4311_v62 = vcombine.high %v591_v56, %v595_v57  ;;  %v598_v63 = vld [vmem:[#allocation8 + $0x550] sm:$0xff] }
 0x1ca   :  { %v4316_v16 = vcombine.low %v598_v63, %v602_v1  ;;  %v4762_v55 = vld [vmem:[#allocation10 + $0xc4] ss:$16 sps:$4 sm:$0xff]  }
 0x1cc   :  { %1813 = vmatpush1.bf16.msra.mxu1 %v4252_v8  ;;  %1895 = vmatpush1.bf16.msra.mxu0 %v4254_v9  ;;  %v4310_v8 = vcombine.low %v591_v56, %v595_v57  ;;  %v4317_v9 = vcombine.high %v598_v63, %v602_v1  ;;  %v4765_v56 = vld [vmem:[#allocation10 + $0xcc] ss:$16 sps:$4 sm:$0xff]   ;;  %v4760_v57 = vld [vmem:[#allocation10 + $0xc0] ss:$16 sps:$4 sm:$0xff]   ;;  %v4769_v63 = vld [vmem:[#allocation10 + $0xe8] ss:$16 sps:$4 sm:$0xff]  }
 0x1cd   :  { %1814 = vmatprep.subr.bf16.mxu1 %v4261_v10  ;;  %1896 = vmatprep.subr.bf16.mxu0 %v4263_v12  ;;  %v4319_v10 = vcombine.high %v599_v2, %v603_v3  ;;  %v606_v12 = vld [vmem:[#allocation8 + $0x590] sm:$0xff] }
 0x1ce   :  { %v4324_v26 = vcombine.low %v606_v12, %v610_v13  ;;  %v4774_v1 = vld [vmem:[#allocation10 + $0x104] ss:$16 sps:$4 sm:$0xff]  }
 0x1d0   :  { %1815 = vmatpush1.bf16.msra.mxu1 %v4260_v17  ;;  %1897 = vmatpush1.bf16.msra.mxu0 %v4262_v18  ;;  %v4318_v17 = vcombine.low %v599_v2, %v603_v3  ;;  %v4325_v18 = vcombine.high %v606_v12, %v610_v13  ;;  %v4777_v2 = vld [vmem:[#allocation10 + $0x10c] ss:$16 sps:$4 sm:$0xff]   ;;  %v4772_v3 = vld [vmem:[#allocation10 + $0x100] ss:$16 sps:$4 sm:$0xff]   ;;  %v4781_v12 = vld [vmem:[#allocation10 + $0x128] ss:$16 sps:$4 sm:$0xff]  }
 0x1d1   :  { %1816 = vmatprep.subr.bf16.mxu1 %v4269_v20  ;;  %1898 = vmatprep.subr.bf16.mxu0 %v4271_v22  ;;  %v4327_v20 = vcombine.high %v607_v14, %v611_v15  ;;  %v614_v22 = vld [vmem:[#allocation8 + $0x5d0] sm:$0xff] }
 0x1d2   :  { %v4786_v13 = vld [vmem:[#allocation10 + $0x144] ss:$16 sps:$4 sm:$0xff]  }
 0x1d4   :  { %1817 = vmatpush1.bf16.msra.mxu1 %v4268_v27  ;;  %1899 = vmatpush1.bf16.msra.mxu0 %v4270_v28  ;;  %v4326_v27 = vcombine.low %v607_v14, %v611_v15  ;;  %v4333_v28 = vcombine.high %v614_v22, %v618_v23  ;;  %v4789_v14 = vld [vmem:[#allocation10 + $0x14c] ss:$16 sps:$4 sm:$0xff]   ;;  %v4784_v15 = vld [vmem:[#allocation10 + $0x140] ss:$16 sps:$4 sm:$0xff]  }
 0x1d5   :  { %1827 = vmatprep.subr.bf16.mxu1 %v4277_v29  ;;  %1909 = vmatprep.subr.bf16.mxu0 %v4279_v30  ;;  %v4335_v29 = vcombine.high %v615_v24, %v619_v25  ;;  %v4332_v30 = vcombine.low %v614_v22, %v618_v23  ;;  %v4795_v22 = vld [vmem:[#allocation10 + $0x16c] ss:$16 sps:$4 sm:$0xff]   ;;  %v4790_v24 = vld [vmem:[#allocation10 + $0x160] ss:$16 sps:$4 sm:$0xff]   ;;  %v4793_v25 = vld [vmem:[#allocation10 + $0x168] ss:$16 sps:$4 sm:$0xff]  }
 0x1d7   :  { %1819 = vmatmul.mubr.bf16.vlgmr.msra.gmra.mrb[4].mxu1 %v5455_v59  ;;  %1901 = vmatmul.mubr.bf16.vlgmr.msra.gmra.mrb[8].mxu0 %v5455_v59  ;;  %v4294_v59 = vcombine.low %v575_v42, %v579_v43  ;;  %v4741_v42 = vld [vmem:[#allocation10 + $0x4c] ss:$16 sps:$4 sm:$0xff]   ;;  %v4736_v43 = vld [vmem:[#allocation10 + $0x40] ss:$16 sps:$4 sm:$0xff]  }
 0x1d8   :  { %1828 = vmatpush1.bf16.msra.mxu1 %v4276_v36  ;;  %1910 = vmatpush1.bf16.msra.mxu0 %v4278_v37  ;;  %v4729_v36 = vld [vmem:[#allocation10 + $0xc] ss:$16 sps:$4 sm:$0xff]   ;;  %v4732_v37 = vld [vmem:[#allocation10 + $0x24] ss:$16 sps:$4 sm:$0xff]  }
 0x1d9   :  { %1829 = vmatprep.subr.bf16.mxu1 %v4285_v38  ;;  %1911 = vmatprep.subr.bf16.mxu0 %v4287_v39  ;;  %v4735_v38 = vld [vmem:[#allocation10 + $0x2c] ss:$16 sps:$4 sm:$0xff]   ;;  %v4730_v39 = vld [vmem:[#allocation10 + $0x20] ss:$16 sps:$4 sm:$0xff]  }
 0x1da   :  { %1859 = vmatprep.mubr.bf16.mxu1 %v5226_v0  ;;  %1941 = vmatprep.mubr.bf16.mxu0 %v5226_v0 }
 0x1dc   :  { %1830 = vmatpush1.bf16.msra.mxu1 %v4284_v44  ;;  %1912 = vmatpush1.bf16.msra.mxu0 %v4286_v45  ;;  %v4739_v44 = vld [vmem:[#allocation10 + $0x48] ss:$16 sps:$4 sm:$0xff]   ;;  %v4744_v45 = vld [vmem:[#allocation10 + $0x64] ss:$16 sps:$4 sm:$0xff]  }
 0x1dd   :  { %1831 = vmatprep.subr.bf16.mxu1 %v4293_v46  ;;  %1913 = vmatprep.subr.bf16.mxu0 %v4295_v33  ;;  %v4747_v46 = vld [vmem:[#allocation10 + $0x6c] ss:$16 sps:$4 sm:$0xff]   ;;  %v4742_v33 = vld [vmem:[#allocation10 + $0x60] ss:$16 sps:$4 sm:$0xff]  }
 0x1e0   :  { %1832 = vmatpush1.bf16.msra.mxu1 %v4292_v51  ;;  %1914 = vmatpush1.bf16.msra.mxu0 %v4294_v59  ;;  %v4751_v51 = vld [vmem:[#allocation10 + $0x88] ss:$16 sps:$4 sm:$0xff]   ;;  %v4756_v59 = vld [vmem:[#allocation10 + $0xa4] ss:$16 sps:$4 sm:$0xff]  }
 0x1e1   :  { %1833 = vmatprep.subr.bf16.mxu1 %v4301_v52  ;;  %1915 = vmatprep.subr.bf16.mxu0 %v4303_v53  ;;  %v4759_v52 = vld [vmem:[#allocation10 + $0xac] ss:$16 sps:$4 sm:$0xff]   ;;  %v4754_v53 = vld [vmem:[#allocation10 + $0xa0] ss:$16 sps:$4 sm:$0xff]  }
 0x1e4   :  { %1834 = vmatpush1.bf16.msra.mxu1 %v4300_v58  ;;  %1916 = vmatpush1.bf16.msra.mxu0 %v4302_v60  ;;  %v4763_v58 = vld [vmem:[#allocation10 + $0xc8] ss:$16 sps:$4 sm:$0xff]   ;;  %v4768_v60 = vld [vmem:[#allocation10 + $0xe4] ss:$16 sps:$4 sm:$0xff]  }
 0x1e5   :  { %1835 = vmatprep.subr.bf16.mxu1 %v4309_v61  ;;  %1917 = vmatprep.subr.bf16.mxu0 %v4311_v62  ;;  %v4771_v61 = vld [vmem:[#allocation10 + $0xec] ss:$16 sps:$4 sm:$0xff]   ;;  %v4766_v62 = vld [vmem:[#allocation10 + $0xe0] ss:$16 sps:$4 sm:$0xff]  }
 0x1e8   :  { %1836 = vmatpush1.bf16.msra.mxu1 %v4308_v4  ;;  %1918 = vmatpush1.bf16.msra.mxu0 %v4310_v8  ;;  %v4775_v4 = vld [vmem:[#allocation10 + $0x108] ss:$16 sps:$4 sm:$0xff]   ;;  %v4780_v8 = vld [vmem:[#allocation10 + $0x124] ss:$16 sps:$4 sm:$0xff]  }
 0x1e9   :  { %1837 = vmatprep.subr.bf16.mxu1 %v4317_v9  ;;  %1919 = vmatprep.subr.bf16.mxu0 %v4319_v10  ;;  %v4783_v9 = vld [vmem:[#allocation10 + $0x12c] ss:$16 sps:$4 sm:$0xff]   ;;  %v4778_v10 = vld [vmem:[#allocation10 + $0x120] ss:$16 sps:$4 sm:$0xff]  }
 0x1ec   :  { %1838 = vmatpush1.bf16.msra.mxu1 %v4316_v16  ;;  %1920 = vmatpush1.bf16.msra.mxu0 %v4318_v17  ;;  %v4787_v16 = vld [vmem:[#allocation10 + $0x148] ss:$16 sps:$4 sm:$0xff]  }
 0x1ed   :  { %1839 = vmatprep.subr.bf16.mxu1 %v4325_v18  ;;  %1921 = vmatprep.subr.bf16.mxu0 %v4327_v20  ;;  %v5491_v17 = vld [vmem:[%s5749_s5] sm:$0xff]  ;;  %v5494_v18 = vsub.s32 1, %v5462_v6  ;;  %v4792_v20 = vld [vmem:[#allocation10 + $0x164] ss:$16 sps:$4 sm:$0xff]  }
 0x1ee   :  { %v625_v23 = vrot.slane %v5491_v17, %v5465_v21 }
 0x1f0   :  { %1840 = vmatpush1.bf16.msra.mxu1 %v4324_v26  ;;  %1922 = vmatpush1.bf16.msra.mxu0 %v4326_v27  ;;  %v629_v26 = vrot.slane %v5491_v17, %v5494_v18  ;;  %v5501_v27 = vsub.s32 3, %v5462_v6 }
 0x1f1   :  { %1841 = vmatprep.subr.bf16.mxu1 %v4333_v28  ;;  %1923 = vmatprep.subr.bf16.mxu0 %v4335_v29  ;;  %v4798_v28 = vld [vmem:[#allocation10 + $0x184] ss:$16 sps:$4 sm:$0xff]   ;;  %v4796_v29 = vld [vmem:[#allocation10 + $0x180] ss:$16 sps:$4 sm:$0xff]  }
 0x1f4   :  { %1842 = vmatpush1.bf16.msra.mxu1 %v4332_v30  ;;  %1924 = vmatpush1.bf16.msra.mxu0 %v4334_v31  ;;  %v4799_v30 = vld [vmem:[#allocation10 + $0x188] ss:$16 sps:$4 sm:$0xff]   ;;  %v4801_v31 = vld [vmem:[#allocation10 + $0x18c] ss:$16 sps:$4 sm:$0xff]  }
 0x1f5   :  { %2598 = vmatprep.subr.bf16.mxu1 %v4726_v34  ;;  %2680 = vmatprep.subr.bf16.mxu0 %v4729_v36  ;;  %v4807_v36 = vld [vmem:[#allocation10 + $0x1ac] ss:$16 sps:$4 sm:$0xff]  }
 0x1f7   :  { %1860 = vmatmul.mubr.bf16.vlgmr.msra.gmra.mrb[4].mxu1 %v5476_v19  ;;  %1942 = vmatmul.mubr.bf16.vlgmr.msra.gmra.mrb[8].mxu0 %v5476_v19 }
 0x1f8   :  { %2599 = vmatpush1.bf16.msra.mxu1 %v4724_v32  ;;  %2681 = vmatpush1.bf16.msra.mxu0 %v4727_v35  ;;  %v4804_v35 = vld [vmem:[#allocation10 + $0x1a4] ss:$16 sps:$4 sm:$0xff]  }
 0x1f9   :  { %2600 = vmatprep.subr.bf16.mxu1 %v4732_v37  ;;  %2682 = vmatprep.subr.bf16.mxu0 %v4735_v38 }
 0x1fc   :  { %2601 = vmatpush1.bf16.msra.mxu1 %v4730_v39  ;;  %2683 = vmatpush1.bf16.msra.mxu0 %v4733_v40 }
 0x1fd   :  { %2602 = vmatprep.subr.bf16.mxu1 %v4738_v41  ;;  %2684 = vmatprep.subr.bf16.mxu0 %v4741_v42 }
 0x200   :  { %2603 = vmatpush1.bf16.msra.mxu1 %v4736_v43  ;;  %2685 = vmatpush1.bf16.msra.mxu0 %v4739_v44  ;;  %v4802_v43 = vld [vmem:[#allocation10 + $0x1a0] ss:$16 sps:$4 sm:$0xff]  }
 0x201   :  { %2604 = vmatprep.subr.bf16.mxu1 %v4744_v45  ;;  %2686 = vmatprep.subr.bf16.mxu0 %v4747_v46 }
 0x204   :  { %2605 = vmatpush1.bf16.msra.mxu1 %v4742_v33  ;;  %2687 = vmatpush1.bf16.msra.mxu0 %v4745_v47  ;;  %v4805_v33 = vld [vmem:[#allocation10 + $0x1a8] ss:$16 sps:$4 sm:$0xff]  }
 0x205   :  { %2606 = vmatprep.subr.bf16.mxu1 %v4750_v48  ;;  %2688 = vmatprep.subr.bf16.mxu0 %v4753_v49  ;;  %v637_v48 = vrot.slane %v5491_v17, %v5501_v27  ;;  %v4810_v49 = vld [vmem:[#allocation10 + $0x1c4] ss:$16 sps:$4 sm:$0xff]  }
 0x208   :  { %2607 = vmatpush1.bf16.msra.mxu1 %v4748_v50  ;;  %2689 = vmatpush1.bf16.msra.mxu0 %v4751_v51  ;;  %v4813_v50 = vld [vmem:[#allocation10 + $0x1cc] ss:$16 sps:$4 sm:$0xff]   ;;  %v5506_v51 = vsub.s32 2, %v5462_v6 }
 0x209   :  { %2608 = vmatprep.subr.bf16.mxu1 %v4756_v59  ;;  %2690 = vmatprep.subr.bf16.mxu0 %v4759_v52  ;;  %v261_v59 = vrot.slane %v5470_v7, %v5494_v18  ;;  %v4808_v52 = vld [vmem:[#allocation10 + $0x1c0] ss:$16 sps:$4 sm:$0xff]  }
 0x20c   :  { %2609 = vmatpush1.bf16.msra.mxu1 %v4754_v53  ;;  %2691 = vmatpush1.bf16.msra.mxu0 %v4757_v54  ;;  %v4811_v53 = vld [vmem:[#allocation10 + $0x1c8] ss:$16 sps:$4 sm:$0xff]  }
 0x20d   :  { %2610 = vmatprep.subr.bf16.mxu1 %v4762_v55  ;;  %2692 = vmatprep.subr.bf16.mxu0 %v4765_v56  ;;  %v4816_v55 = vld [vmem:[#allocation10 + $0x1e4] ss:$16 sps:$4 sm:$0xff]   ;;  %v4819_v56 = vld [vmem:[#allocation10 + $0x1ec] ss:$16 sps:$4 sm:$0xff]  }
 0x210   :  { %2611 = vmatpush1.bf16.msra.mxu1 %v4760_v57  ;;  %2693 = vmatpush1.bf16.msra.mxu0 %v4763_v58  ;;  %v633_v57 = vrot.slane %v5491_v17, %v5506_v51  ;;  %v413_v58 = vadd.f32 %v5474_v11, %v261_v59 }
 0x211   :  { %2612 = vmatprep.subr.bf16.mxu1 %v4768_v60  ;;  %2694 = vmatprep.subr.bf16.mxu0 %v4771_v61  ;;  %v4814_v60 = vld [vmem:[#allocation10 + $0x1e0] ss:$16 sps:$4 sm:$0xff]   ;;  %v4817_v61 = vld [vmem:[#allocation10 + $0x1e8] ss:$16 sps:$4 sm:$0xff]  }
 0x214   :  { %2613 = vmatpush1.bf16.msra.mxu1 %v4766_v62  ;;  %2695 = vmatpush1.bf16.msra.mxu0 %v4769_v63 }
 0x215   :  { %2614 = vmatprep.subr.bf16.mxu1 %v4774_v1  ;;  %2696 = vmatprep.subr.bf16.mxu0 %v4777_v2 }
 0x218   :  { %2615 = vmatpush1.bf16.msra.mxu1 %v4772_v3  ;;  %2697 = vmatpush1.bf16.msra.mxu0 %v4775_v4  ;;  %v4822_v3 = vld [vmem:[#allocation10 + $0x204] ss:$16 sps:$4 sm:$0xff]   ;;  %v4825_v4 = vld [vmem:[#allocation10 + $0x20c] ss:$16 sps:$4 sm:$0xff]  }
 0x219   :  { %2616 = vmatprep.subr.bf16.mxu1 %v4780_v8  ;;  %2698 = vmatprep.subr.bf16.mxu0 %v4783_v9 }
 0x21c   :  { %2617 = vmatpush1.bf16.msra.mxu1 %v4778_v10  ;;  %2699 = vmatpush1.bf16.msra.mxu0 %v4781_v12 }
 0x21d   :  { %2618 = vmatprep.subr.bf16.mxu1 %v4786_v13  ;;  %2700 = vmatprep.subr.bf16.mxu0 %v4789_v14 }
 0x220   :  { %2619 = vmatpush1.bf16.msra.mxu1 %v4784_v15  ;;  %2701 = vmatpush1.bf16.msra.mxu0 %v4787_v16 }
 0x221   :  { %2620 = vmatprep.subr.bf16.mxu1 %v4792_v20  ;;  %2702 = vmatprep.subr.bf16.mxu0 %v4795_v22 }
 0x224   :  { %2621 = vmatpush1.bf16.msra.mxu1 %v4790_v24  ;;  %2703 = vmatpush1.bf16.msra.mxu0 %v4793_v25  ;;  %v5517_v25 = vsub.s32 4, %v5462_v6 }
 0x225   :  { %2622 = vmatprep.subr.bf16.mxu1 %v4798_v28  ;;  %2704 = vmatprep.subr.bf16.mxu0 %v4801_v31 }
 0x226   :  { %v641_v28 = vrot.slane %v5491_v17, %v5517_v25 }
 0x228   :  { %2623 = vmatpush1.bf16.msra.mxu1 %v4796_v29  ;;  %2705 = vmatpush1.bf16.msra.mxu0 %v4799_v30 }
 0x229   :  { %2624 = vmatprep.subr.bf16.mxu1 %v4804_v35  ;;  %2706 = vmatprep.subr.bf16.mxu0 %v4807_v36 }
 0x22c   :  { %2625 = vmatpush1.bf16.msra.mxu1 %v4802_v43  ;;  %2707 = vmatpush1.bf16.msra.mxu0 %v4805_v33 }
 0x22d   :  { %2626 = vmatprep.subr.bf16.mxu1 %v4810_v49  ;;  %2708 = vmatprep.subr.bf16.mxu0 %v4813_v50 }
 0x230   :  { %2627 = vmatpush1.bf16.msra.mxu1 %v4808_v52  ;;  %2709 = vmatpush1.bf16.msra.mxu0 %v4811_v53 }
 0x231   :  { %2628 = vmatprep.subr.bf16.mxu1 %v4816_v55  ;;  %2710 = vmatprep.subr.bf16.mxu0 %v4819_v56 }
 0x234   :  { %2629 = vmatpush1.bf16.msra.mxu1 %v4814_v60  ;;  %2711 = vmatpush1.bf16.msra.mxu0 %v4817_v61 }
 0x235   :  { %2639 = vmatprep.subr.bf16.mxu1 %v4822_v3  ;;  %2721 = vmatprep.subr.bf16.mxu0 %v4825_v4  ;;  %v4828_v4 = vld [vmem:[#allocation10 + $0x224] ss:$16 sps:$4 sm:$0xff]  }
 0x26a   :  { %v1697_v32 = vpop.f32.mrb[0].mxu1  ;;  %v1779_v34 = vpop.f32.mrb[4].mxu0 }
 0x26b   :  { %v4639_v37 = vadd.f32 %v1697_v32, %v625_v23  ;;  %v1699_v38 = vpop.f32.mrb[1].mxu1  ;;  %v1781_v39 = vpop.f32.mrb[5].mxu0  ;;  %v4641_v7 = vadd.f32 %v1779_v34, %v633_v57  ;;  %v5527_v32 = vsub.s32 7, %v5462_v6 }
 0x26c   :  { %v4640_v40 = vadd.f32 %v1699_v38, %v629_v26  ;;  %v1701_v41 = vpop.f32.mrb[2].mxu1  ;;  %v1783_v42 = vpop.f32.mrb[6].mxu0  ;;  %v4642_v54 = vadd.f32 %v1781_v39, %v637_v48  ;;  %v5520_v26 = vsub.s32 5, %v5462_v6 }
 0x26d   :  { %v4336_v44 = vmul.f32 -1.442695, %v4639_v37  ;;  %v1702_v45 = vpop.f32.mrb[3].mxu1  ;;  %v1784_v46 = vpop.f32.mrb[7].mxu0 }
 0x26e   :  { %v4337_v47 = vmul.f32 -1.442695, %v4640_v40  ;;  %v4338_v62 = vmul.f32 -1.442695, %v4642_v54  ;;  %v645_v29 = vrot.slane %v5491_v17, %v5520_v26  ;;  %v5532_v45 = vsub.s32 6, %v5462_v6 }
 0x26f   :  { %4906 = vpow2.f32 %v4336_v44  ;;  %v653_v44 = vrot.slane %v5491_v17, %v5527_v32 }
 0x270   :  { %4908 = vpow2.f32 %v4337_v47  ;;  %v649_v33 = vrot.slane %v5491_v17, %v5532_v45 }
 0x271   :  { %4910 = vtanh.f32 %v413_v58 }
 0x272   :  { %4912 = vpow2.f32 %v4338_v62 }
 0x273   :  { %4914 = vtanh.f32 %v4641_v7 }
 0x279   :  { %v4907_v63 = vpop.eup %4906 }
 0x27a   :  { %v4909_v1 = vpop.eup %4908  ;;  %v1953_v2 = vadd.f32 1.0, %v4907_v63 }
 0x27b   :  { %v1959_v8 = vadd.f32 1.0, %v4909_v1  ;;  %v5513_v11 = vpop.eup %4910  ;;  %v4820_v1 = vld [vmem:[#allocation10 + $0x200] ss:$16 sps:$4 sm:$0xff]  }
 0x27c   :  { %4916 = vrcp.f32 %v1953_v2  ;;  %v4913_v9 = vpop.eup %4912  ;;  %v4823_v2 = vld [vmem:[#allocation10 + $0x208] ss:$16 sps:$4 sm:$0xff]  }
 0x27d   :  { %4918 = vrcp.f32 %v1959_v8  ;;  %v4915_v10 = vpop.eup %4914  ;;  %v1966_v15 = vadd.f32 1.0, %v4913_v9  ;;  %v4831_v8 = vld [vmem:[#allocation10 + $0x22c] ss:$16 sps:$4 sm:$0xff]   ;;  %v4826_v9 = vld [vmem:[#allocation10 + $0x220] ss:$16 sps:$4 sm:$0xff]  }
 0x27f   :  { %4920 = vrcp.f32 %v1966_v15  ;;  %v4835_v15 = vld [vmem:[#allocation10 + $0x248] ss:$16 sps:$4 sm:$0xff]  }
 0x286   :  { %v4917_v12 = vpop.eup %4916 }
 0x287   :  { %v4919_v13 = vpop.eup %4918  ;;  %v1970_v14 = vmul.f32 %v4917_v12, %v4915_v10  ;;  %v4829_v10 = vld [vmem:[#allocation10 + $0x228] ss:$16 sps:$4 sm:$0xff]   ;;  %v4834_v12 = vld [vmem:[#allocation10 + $0x244] ss:$16 sps:$4 sm:$0xff]  }
 0x288   :  { %v1969_v16 = vmul.f32 %v4919_v13, %v5513_v11  ;;  %v4837_v13 = vld [vmem:[#allocation10 + $0x24c] ss:$16 sps:$4 sm:$0xff]  }
 0x289   :  { %v4921_v22 = vpop.eup %4920 }
 0x28a   :  { %v1971_v20 = vadd.f32 %v1970_v14, %v1969_v16  ;;  %v4832_v14 = vld [vmem:[#allocation10 + $0x240] ss:$16 sps:$4 sm:$0xff]   ;;  %v4840_v16 = vld [vmem:[#allocation10 + $0x264] ss:$16 sps:$4 sm:$0xff]  }
 0x28c   :  { %4922 = vtanh.f32 %v1971_v20  ;;  %v4843_v20 = vld [vmem:[#allocation10 + $0x26c] ss:$16 sps:$4 sm:$0xff]  }
 0x296   :  { %v4923_v23 = vpop.eup %4922 }
 0x297   :  { %v1973_v24 = vmul.f32 %v4923_v23, %v4921_v22  ;;  %v4838_v22 = vld [vmem:[#allocation10 + $0x260] ss:$16 sps:$4 sm:$0xff]   ;;  %v4841_v23 = vld [vmem:[#allocation10 + $0x268] ss:$16 sps:$4 sm:$0xff]  }
 0x299   :  { %v1998_v3 = vpack.c.bf16 %v1973_v24, %v1973_v24  ;;  %v4846_v24 = vld [vmem:[#allocation10 + $0x284] ss:$16 sps:$4 sm:$0xff]  }
 0x2ca   :  { %v1861_v30 = vpop.f32.mrb[4].mxu1  ;;  %v1943_v31 = vpop.f32.mrb[8].mxu0 }
 0x2cb   :  { %v4643_v34 = vadd.f32 %v1861_v30, %v641_v28  ;;  %v1863_v35 = vpop.f32.mrb[5].mxu1  ;;  %v1945_v36 = vpop.f32.mrb[9].mxu0  ;;  %v4645_v48 = vadd.f32 %v1943_v31, %v649_v33  ;;  %v4849_v28 = vld [vmem:[#allocation10 + $0x28c] ss:$16 sps:$4 sm:$0xff]   ;;  %v4852_v30 = vld [vmem:[#allocation10 + $0x2a4] ss:$16 sps:$4 sm:$0xff]  }
 0x2cc   :  { %v4644_v37 = vadd.f32 %v1863_v35, %v645_v29  ;;  %v1865_v38 = vpop.f32.mrb[6].mxu1  ;;  %v1947_v39 = vpop.f32.mrb[10].mxu0  ;;  %v4646_v46 = vadd.f32 %v1945_v36, %v653_v44  ;;  %v4844_v29 = vld [vmem:[#allocation10 + $0x280] ss:$16 sps:$4 sm:$0xff]   ;;  %v4855_v31 = vld [vmem:[#allocation10 + $0x2ac] ss:$16 sps:$4 sm:$0xff]  }
 0x2cd   :  { %v4339_v40 = vmul.f32 -1.442695, %v4643_v34  ;;  %v1866_v41 = vpop.f32.mrb[7].mxu1  ;;  %v1948_v42 = vpop.f32.mrb[11].mxu0  ;;  %v4850_v34 = vld [vmem:[#allocation10 + $0x2a0] ss:$16 sps:$4 sm:$0xff]  }
 0x2ce   :  { %v4340_v43 = vmul.f32 -1.442695, %v4644_v37  ;;  %v4341_v47 = vmul.f32 -1.442695, %v4646_v46  ;;  %v4853_v35 = vld [vmem:[#allocation10 + $0x2a8] ss:$16 sps:$4 sm:$0xff]  }
 0x2cf   :  { %4924 = vpow2.f32 %v4339_v40  ;;  %v4858_v36 = vld [vmem:[#allocation10 + $0x2c4] ss:$16 sps:$4 sm:$0xff]   ;;  %v4861_v37 = vld [vmem:[#allocation10 + $0x2cc] ss:$16 sps:$4 sm:$0xff]   ;;  %v4856_v38 = vld [vmem:[#allocation10 + $0x2c0] ss:$16 sps:$4 sm:$0xff]  }
 0x2d0   :  { %4926 = vpow2.f32 %v4340_v43  ;;  %v4859_v39 = vld [vmem:[#allocation10 + $0x2c8] ss:$16 sps:$4 sm:$0xff]   ;;  %v4864_v40 = vld [vmem:[#allocation10 + $0x2e4] ss:$16 sps:$4 sm:$0xff]   ;;  %v4867_v41 = vld [vmem:[#allocation10 + $0x2ec] ss:$16 sps:$4 sm:$0xff]  }
 0x2d1   :  { %4928 = vpow2.f32 %v4341_v47  ;;  %v4862_v42 = vld [vmem:[#allocation10 + $0x2e0] ss:$16 sps:$4 sm:$0xff]   ;;  %v4865_v43 = vld [vmem:[#allocation10 + $0x2e8] ss:$16 sps:$4 sm:$0xff]   ;;  %v5227_v33 = vmov 0.0  }
 0x2d2   :  { %4930 = vtanh.f32 %v4645_v48  ;;  %v4868_v44 = vld [vmem:[#allocation13] sm:$0xff]   ;;  %v4870_v47 = vld [vmem:[#allocation13 + $0x8] sm:$0xff]  }
 0x2d3   :  { %v4869_v46 = vld [vmem:[#allocation11] sm:$0xff]   ;;  %v4871_v48 = vld [vmem:[#allocation11 + $0x8] sm:$0xff]  }
 0x2d9   :  { %v4925_v49 = vpop.eup %4924 }
 0x2da   :  { %v4927_v50 = vpop.eup %4926  ;;  %v1977_v59 = vadd.f32 1.0, %v4925_v49  ;;  %v4872_v49 = vld [vmem:[#allocation13 + $0x10] sm:$0xff]  }
 0x2db   :  { %v1983_v52 = vadd.f32 1.0, %v4927_v50  ;;  %v4929_v53 = vpop.eup %4928  ;;  %v4873_v50 = vld [vmem:[#allocation11 + $0x10] sm:$0xff]  }
 0x2dc   :  { %4932 = vrcp.f32 %v1977_v59  ;;  %v4931_v54 = vpop.eup %4930  ;;  %v1990_v58 = vadd.f32 1.0, %v4929_v53  ;;  %v4875_v59 = vld [vmem:[#allocation11 + $0x18] sm:$0xff]   ;;  %v4877_v53 = vld [vmem:[#allocation11 + $0x20] sm:$0xff]  }
 0x2dd   :  { %4934 = vrcp.f32 %v1983_v52  ;;  %v4876_v52 = vld [vmem:[#allocation13 + $0x20] sm:$0xff]  }
 0x2de   :  { %4936 = vrcp.f32 %v1990_v58  ;;  %v4879_v58 = vld [vmem:[#allocation11 + $0x28] sm:$0xff]  }
 0x2e6   :  { %v4933_v55 = vpop.eup %4932 }
 0x2e7   :  { %v4935_v56 = vpop.eup %4934  ;;  %v1994_v57 = vmul.f32 %v4933_v55, %v4931_v54  ;;  %v4878_v54 = vld [vmem:[#allocation13 + $0x28] sm:$0xff]   ;;  %v5546_v55 = vld [vmem:[#allocation2] sm:$0xf] }
 0x2e8   :  { %v1993_v60 = vmul.f32 %v4935_v56, %v5513_v11  ;;  %v4937_v17 = vpop.eup %4936  ;;  %v5548_v56 = vld [vmem:[#allocation2 + $0x4] sm:$0xf] }
 0x2ea   :  { %v1995_v61 = vadd.f32 %v1994_v57, %v1993_v60  ;;  %v4441_v57 = vcombine.low %v5546_v55, %v5548_v56  ;;  %v4880_v60 = vld [vmem:[#allocation13 + $0x30] sm:$0xff]  }
 0x2ec   :  { %4938 = vtanh.f32 %v1995_v61  ;;  %v4881_v61 = vld [vmem:[#allocation11 + $0x30] sm:$0xff]  }
 0x2f6   :  { %v4939_v62 = vpop.eup %4938 }
 0x2f7   :  { %v1997_v7 = vmul.f32 %v4939_v62, %v4937_v17  ;;  %v4882_v17 = vld [vmem:[#allocation13 + $0x38] sm:$0xff]  }
 0x2f8   :  { %v4883_v62 = vld [vmem:[#allocation11 + $0x38] sm:$0xff]  }
 0x2f9   :  { %v1999_v63 = vpack.c.bf16 %v1997_v7, %v1997_v7  ;;  %v5558_v7 = vld [vmem:[#allocation2 + $0x8] sm:$0xf] }
 0x2fb   :  { %2630 = vmatprep.mubr.bf16.mxu1 %v1999_v63  ;;  %2712 = vmatprep.mubr.bf16.mxu0 %v1999_v63  ;;  %v5560_v63 = vld [vmem:[#allocation2 + $0xc] sm:$0xf] }
 0x2fc   :  { %2631 = vmatmul.mubr.bf16.vlgmr.msra.gmra.mrb[8].mxu1 %v1998_v3  ;;  %2713 = vmatmul.mubr.bf16.vlgmr.msra.gmra.mrb[12].mxu0 %v1998_v3  ;;  %v5566_v3 = vld [vmem:[#allocation2 + $0x14] sm:$0xf] }
 0x2fd   :  { %2640 = vmatpush1.bf16.msra.mxu1 %v4820_v1  ;;  %2722 = vmatpush1.bf16.msra.mxu0 %v4823_v2  ;;  %v4442_v1 = vcombine.low %v5558_v7, %v5560_v63  ;;  %v5564_v2 = vld [vmem:[#allocation2 + $0x10] sm:$0xf] }
 0x2fe   :  { %2641 = vmatprep.subr.bf16.mxu1 %v4828_v4  ;;  %2723 = vmatprep.subr.bf16.mxu0 %v4831_v8  ;;  %v4443_v4 = vcombine.low %v5564_v2, %v5566_v3  ;;  %v5571_v8 = vld [vmem:[#allocation2 + $0x18] sm:$0xf] }
 0x2ff   :  { %2671 = vmatprep.mubr.bf16.mxu1 %v5226_v0  ;;  %2753 = vmatprep.mubr.bf16.mxu0 %v5226_v0  ;;  %v4847_v0 = vld [vmem:[#allocation10 + $0x288] ss:$16 sps:$4 sm:$0xff]  }
 0x301   :  { %2642 = vmatpush1.bf16.msra.mxu1 %v4826_v9  ;;  %2724 = vmatpush1.bf16.msra.mxu0 %v4829_v10  ;;  %v5573_v9 = vld [vmem:[#allocation2 + $0x1c] sm:$0xf] }
 0x302   :  { %2643 = vmatprep.subr.bf16.mxu1 %v4834_v12  ;;  %2725 = vmatprep.subr.bf16.mxu0 %v4837_v13  ;;  %v4444_v10 = vcombine.low %v5571_v8, %v5573_v9  ;;  %v2096_v12 = vld [vmem:[%s5751_s7] sm:$0xf] }
 0x303   :  { %v2101_v13 = vrot.slane %v2096_v12, %v5465_v21 }
 0x305   :  { %2644 = vmatpush1.bf16.msra.mxu1 %v4832_v14  ;;  %2726 = vmatpush1.bf16.msra.mxu0 %v4835_v15  ;;  %v2105_v14 = vrot.slane %v2096_v12, %v5494_v18 }
 0x306   :  { %2645 = vmatprep.subr.bf16.mxu1 %v4840_v16  ;;  %2727 = vmatprep.subr.bf16.mxu0 %v4843_v20 }
 0x309   :  { %2646 = vmatpush1.bf16.msra.mxu1 %v4838_v22  ;;  %2728 = vmatpush1.bf16.msra.mxu0 %v4841_v23 }
 0x30a   :  { %2647 = vmatprep.subr.bf16.mxu1 %v4846_v24  ;;  %2729 = vmatprep.subr.bf16.mxu0 %v4849_v28 }
 0x30d   :  { %2648 = vmatpush1.bf16.msra.mxu1 %v4844_v29  ;;  %2730 = vmatpush1.bf16.msra.mxu0 %v4847_v0 }
 0x30e   :  { %2649 = vmatprep.subr.bf16.mxu1 %v4852_v30  ;;  %2731 = vmatprep.subr.bf16.mxu0 %v4855_v31 }
 0x311   :  { %2650 = vmatpush1.bf16.msra.mxu1 %v4850_v34  ;;  %2732 = vmatpush1.bf16.msra.mxu0 %v4853_v35  ;;  %v2113_v35 = vrot.slane %v2096_v12, %v5501_v27 }
 0x312   :  { %2651 = vmatprep.subr.bf16.mxu1 %v4858_v36  ;;  %2733 = vmatprep.subr.bf16.mxu0 %v4861_v37  ;;  %v2109_v37 = vrot.slane %v2096_v12, %v5506_v51 }
 0x315   :  { %2652 = vmatpush1.bf16.msra.mxu1 %v4856_v38  ;;  %2734 = vmatpush1.bf16.msra.mxu0 %v4859_v39 }
 0x316   :  { %2653 = vmatprep.subr.bf16.mxu1 %v4864_v40  ;;  %2735 = vmatprep.subr.bf16.mxu0 %v4867_v41 }
 0x319   :  { %2654 = vmatpush1.bf16.msra.mxu1 %v4862_v42  ;;  %2736 = vmatpush1.bf16.msra.mxu0 %v4865_v43 }
 0x31a   :  { %4571 = vmatprep.subr.bf16.mxu0 %v5227_v33  ;;  %4547 = vmatprep.subr.bf16.mxu1 %v4868_v44 }
 0x31c   :  { %2672 = vmatmul.mubr.bf16.vlgmr.msra.gmra.mrb[8].mxu1 %v5476_v19  ;;  %2754 = vmatmul.mubr.bf16.vlgmr.msra.gmra.mrb[12].mxu0 %v5476_v19  ;;  %v4874_v19 = vld [vmem:[#allocation13 + $0x18] sm:$0xff]  }
 0x31d   :  { %4572 = vmatpush3.bf16.msra.mxu0 %v4869_v46  ;;  %4548 = vmatpush3.bf16.msra.mxu1 %v4868_v44 }
 0x31e   :  { %4573 = vmatprep.subr.bf16.mxu0 %v5227_v33  ;;  %4549 = vmatprep.subr.bf16.mxu1 %v4870_v47 }
 0x31f   :  { %4587 = vmatprep.mubr.msk.bf16.mxu0 %vm5228_vm7, %v5227_v33  ;;  %4563 = vmatprep.mubr.bf16.mxu1 %v4441_v57 }
 0x321   :  { %4574 = vmatpush3.bf16.msra.mxu0 %v4871_v48  ;;  %4550 = vmatpush3.bf16.msra.mxu1 %v4870_v47 }
 0x322   :  { %4575 = vmatprep.subr.bf16.mxu0 %v5227_v33  ;;  %4551 = vmatprep.subr.bf16.mxu1 %v4872_v49 }
 0x325   :  { %4576 = vmatpush3.bf16.msra.mxu0 %v4873_v50  ;;  %4552 = vmatpush3.bf16.msra.mxu1 %v4872_v49 }
 0x326   :  { %4577 = vmatprep.subr.bf16.mxu0 %v5227_v33  ;;  %4553 = vmatprep.subr.bf16.mxu1 %v4874_v19 }
 0x329   :  { %4578 = vmatpush3.bf16.msra.mxu0 %v4875_v59  ;;  %4554 = vmatpush3.bf16.msra.mxu1 %v4874_v19 }
 0x32a   :  { %4579 = vmatprep.subr.bf16.mxu0 %v5227_v33  ;;  %4555 = vmatprep.subr.bf16.mxu1 %v4876_v52 }
 0x32d   :  { %4580 = vmatpush3.bf16.msra.mxu0 %v4877_v53  ;;  %4556 = vmatpush3.bf16.msra.mxu1 %v4876_v52 }
 0x32e   :  { %4581 = vmatprep.subr.bf16.mxu0 %v5227_v33  ;;  %4557 = vmatprep.subr.bf16.mxu1 %v4878_v54 }
 0x331   :  { %4582 = vmatpush3.bf16.msra.mxu0 %v4879_v58  ;;  %4558 = vmatpush3.bf16.msra.mxu1 %v4878_v54 }
 0x332   :  { %4583 = vmatprep.subr.bf16.mxu0 %v5227_v33  ;;  %4559 = vmatprep.subr.bf16.mxu1 %v4880_v60 }
 0x335   :  { %4584 = vmatpush3.bf16.msra.mxu0 %v4881_v61  ;;  %4560 = vmatpush3.bf16.msra.mxu1 %v4880_v60 }
 0x336   :  { %4585 = vmatprep.subr.bf16.mxu0 %v5227_v33  ;;  %4561 = vmatprep.subr.bf16.mxu1 %v4882_v17 }
 0x339   :  { %4586 = vmatpush3.bf16.msra.mxu0 %v4883_v62  ;;  %4562 = vmatpush3.bf16.msra.mxu1 %v4882_v17 }
 0x33a   :  { %4591 = vmatprep.subr.bf16.mxu0 %v5227_v33  ;;  %4597 = vmatprep.subr.bf16.mxu1 %v5227_v33 }
 0x33c   :  { %4564 = vmatmul.mubr.bf16.vlgmr.msra.gmra.mrb[12].mxu1 %v4442_v1 }
 0x33d   :  { %4567 = vmatprep.mubr.bf16.mxu1 %v4443_v4 }
 0x344   :  { %4568 = vmatmul.mubr.bf16.gmra.mrb[16].mxu1 %v4444_v10  ;;  %v5229_v10 = vmov 1966171168  }
 0x345   :  { %4599 = vmatprep.mubr.msk.bf16.mxu1 %vm5228_vm7, %v5227_v33  ;;  %v3054_v12 = vunpack.c.l.s4 %v5229_v10 }
 0x3ef   :  { %v2673_v15 = vpop.f32.mrb[8].mxu1  ;;  %v2755_v16 = vpop.f32.mrb[12].mxu0 }
 0x3f0   :  { %v4647_v20 = vadd.f32 %v2673_v15, %v2101_v13  ;;  %v2675_v22 = vpop.f32.mrb[9].mxu1  ;;  %v2757_v23 = vpop.f32.mrb[13].mxu0  ;;  %v4649_v39 = vadd.f32 %v2755_v16, %v2109_v37  ;;  %v3055_v13 = vunpack.c.0.s8 %v3054_v12 }
 0x3f1   :  { %v4648_v24 = vadd.f32 %v2675_v22, %v2105_v14  ;;  %v2677_v28 = vpop.f32.mrb[10].mxu1  ;;  %v2759_v29 = vpop.f32.mrb[14].mxu0  ;;  %v4650_v36 = vadd.f32 %v2757_v23, %v2113_v35  ;;  %v4453_v14 = vld [vmem:[%s5754_s10] ss:$0 sm:$0xff] }
 0x3f2   :  { %v4438_v0 = vmul.f32 -1.442695, %v4647_v20  ;;  %v2678_v30 = vpop.f32.mrb[11].mxu1  ;;  %v2760_v31 = vpop.f32.mrb[15].mxu0  ;;  %v3058_v15 = vsub.s32 %v3055_v13, %v5462_v6 }
 0x3f3   :  { %v4439_v34 = vmul.f32 -1.442695, %v4648_v24  ;;  %v4440_v38 = vmul.f32 -1.442695, %v4650_v36 }
 0x3f4   :  { %4940 = vpow2.f32 %v4438_v0 }
 0x3f5   :  { %4942 = vpow2.f32 %v4439_v34 }
 0x3f6   :  { %4944 = vpow2.f32 %v4440_v38 }
 0x3f7   :  { %4946 = vtanh.f32 %v4649_v39 }
 0x3fe   :  { %v4941_v40 = vpop.eup %4940 }
 0x3ff   :  { %v4943_v41 = vpop.eup %4942  ;;  %v2765_v42 = vadd.f32 1.0, %v4941_v40 }
 0x400   :  { %v2771_v43 = vadd.f32 1.0, %v4943_v41  ;;  %v4945_v44 = vpop.eup %4944 }
 0x401   :  { %4948 = vrcp.f32 %v2765_v42  ;;  %v4947_v46 = vpop.eup %4946  ;;  %v2778_v50 = vadd.f32 1.0, %v4945_v44 }
 0x402   :  { %4950 = vrcp.f32 %v2771_v43 }
 0x403   :  { %4952 = vrcp.f32 %v2778_v50 }
 0x40b   :  { %v4949_v47 = vpop.eup %4948 }
 0x40c   :  { %v4951_v48 = vpop.eup %4950  ;;  %v2782_v49 = vmul.f32 %v4949_v47, %v4947_v46 }
 0x40d   :  { %v2781_v19 = vmul.f32 %v4951_v48, %v5513_v11  ;;  %v4953_v52 = vpop.eup %4952 }
 0x40f   :  { %v2783_v59 = vadd.f32 %v2782_v49, %v2781_v19  ;;  %v4565_v58 = vpop.f32.mrb[12].mxu1 }
 0x410   :  { %v2909_v60 = vpop.f32.mrb[13].mxu1 }
 0x411   :  { %4954 = vtanh.f32 %v2783_v59  ;;  %v4566_v61 = vpop.f32.mrb[14].mxu1 }
 0x412   :  { %v2912_v17 = vpop.f32.mrb[15].mxu1 }
 0x417   :  { %v4569_v62 = vpop.f32.mrb[16].mxu1 }
 0x418   :  { %v2925_v1 = vpop.f32.mrb[17].mxu1 }
 0x419   :  { %v4570_v11 = vpop.f32.mrb[18].mxu1 }
 0x41a   :  { %v2928_v4 = vpop.f32.mrb[19].mxu1 }
 0x41b   :  { %v4955_v53 = vpop.eup %4954 }
 0x41c   :  { %v2785_v54 = vmul.f32 %v4955_v53, %v4953_v52 }
 0x41e   :  { %v5587_v57 = vpack.c.bf16 %v2785_v54, %v2785_v54 }
 0x420   :  { %4588 = vmatmul.mubr.bf16.vlgmr.msra.gmra.mrb[16].mxu0 %v5587_v57 }
 0x421   :  { %4593 = vmatprep.mubr.msk.bf16.mxu0 %vm5228_vm7, %v5227_v33 }
 0x4f3   :  { %v3045_v16 = vpop.f32.mrb[16].mxu0 }
 0x4f4   :  { %v3046_v20 = vadd.f32 %v4453_v14, %v3045_v16  ;;  %v4589_v22 = vpop.f32.mrb[17].mxu0 }
 0x4f5   :  { %v3048_v23 = vpop.f32.mrb[18].mxu0 }
 0x4f6   :  { %v3052_v24 = vcombine.high %v3046_v20, %v3046_v20  ;;  %v3059_v28 = vrot.slane %v3046_v20, %v3058_v15  ;;  %v4590_v29 = vpop.f32.mrb[19].mxu0 }
 0x4f8   :  { %v3066_v0 = vrot.slane %v3052_v24, %v3058_v15  ;;  %v3067_v30 = vcombine.high %v3059_v28, %v3059_v28  ;;  %v3075_v31 = vrot.slane %v3059_v28, %v3058_v15 }
 0x4fa   :  { %v3068_v34 = vcombine.high %v3066_v0, %v3066_v0  ;;  %v3097_v35 = vcombine.high %v3075_v31, %v3075_v31  ;;  %v3104_v36 = vrot.slane %v3075_v31, %v5465_v21  ;;  %v3089_v37 = vrot.slane %v3067_v30, %v3058_v15 }
 0x4fb   :  { %v3082_v38 = vrot.slane %v3066_v0, %v3058_v15  ;;  %v3197_v0 = vand.u32 127, %v254_v5 }
 0x4fc   :  { %v3112_v39 = vrot.slane %v3097_v35, %v5465_v21  ;;  %v3141_v40 = vadd.f32 %v3104_v36, %v2909_v60  ;;  %v3099_v41 = vcombine.high %v3089_v37, %v3089_v37  ;;  %v3108_v42 = vrot.slane %v3089_v37, %v5465_v21 }
 0x4fd   :  { %v3098_v43 = vcombine.high %v3082_v38, %v3082_v38  ;;  %v3120_v44 = vrot.slane %v3082_v38, %v5465_v21  ;;  %v3096_v46 = vrot.slane %v3068_v34, %v3058_v15  ;;  %v5609_v31 = vsub.s32 %v3197_v0, %v5462_v6 }
 0x4fe   :  { %v3143_v47 = vadd.f32 %v4565_v58, %v3112_v39  ;;  %4956 = vtanh.f32 %v3141_v40  ;;  %v3116_v48 = vrot.slane %v3099_v41, %v5465_v21  ;;  %v3142_v49 = vadd.f32 %v3108_v42, %v2912_v17  ;;  %v4462_v58 = vld [vmem:[%s5755_s11] ss:$0 sm:$0xff] }
 0x4ff   :  { %v3128_v50 = vrot.slane %v3098_v43, %v5465_v21  ;;  %v3145_v19 = vadd.f32 %v3120_v44, %v2925_v1  ;;  %v3100_v59 = vcombine.high %v3096_v46, %v3096_v46  ;;  %v3124_v52 = vrot.slane %v3096_v46, %v5465_v21 }
 0x500   :  { %4958 = vtanh.f32 %v3143_v47  ;;  %v3144_v53 = vadd.f32 %v4566_v61, %v3116_v48 }
 0x501   :  { %4960 = vtanh.f32 %v3142_v49  ;;  %v3147_v54 = vadd.f32 %v4569_v62, %v3128_v50  ;;  %v3132_v60 = vrot.slane %v3100_v59, %v5465_v21  ;;  %v3146_v10 = vadd.f32 %v3124_v52, %v2928_v4 }
 0x502   :  { %4962 = vtanh.f32 %v3144_v53 }
 0x503   :  { %v3148_v12 = vadd.f32 %v4570_v11, %v3132_v60  ;;  %4964 = vtanh.f32 %v3145_v19 }
 0x504   :  { %4966 = vtanh.f32 %v3146_v10 }
 0x505   :  { %4968 = vtanh.f32 %v3147_v54 }
 0x506   :  { %4970 = vtanh.f32 %v3148_v12 }
 0x508   :  { %v4957_v17 = vpop.eup %4956 }
 0x509   :  { %v3164_v1 = vmul.f32 %v4957_v17, %v4462_v58 }
 0x50a   :  { %v4959_v13 = vpop.eup %4958 }
 0x50b   :  { %v4961_v14 = vpop.eup %4960  ;;  %3172 = vadd.xlane.f32.xlu0 %v3164_v1  ;;  %v3166_v61 = vmul.f32 %v4959_v13, %v4462_v58 }
 0x50c   :  { %v4963_v62 = vpop.eup %4962  ;;  %v3165_v15 = vmul.f32 %v4961_v14, %v4462_v58 }
 0x50d   :  { %3176 = vadd.xlane.f32.xlu1 %v3166_v61  ;;  %v4965_v4 = vpop.eup %4964  ;;  %v3167_v11 = vmul.f32 %v4963_v62, %v4462_v58 }
 0x50e   :  { %v4967_v16 = vpop.eup %4966  ;;  %v3168_v20 = vmul.f32 %v4965_v4, %v4462_v58 }
 0x50f   :  { %3174 = vadd.xlane.f32.xlu0 %v3165_v15  ;;  %v4969_v22 = vpop.eup %4968  ;;  %v3169_v23 = vmul.f32 %v4967_v16, %v4462_v58 }
 0x510   :  { %v4971_v24 = vpop.eup %4970  ;;  %v3170_v28 = vmul.f32 %v4969_v22, %v4462_v58 }
 0x511   :  { %3178 = vadd.xlane.f32.xlu1 %v3167_v11  ;;  %v3171_v29 = vmul.f32 %v4971_v24, %v4462_v58 }
 0x513   :  { %3180 = vadd.xlane.f32.xlu0 %v3168_v20 }
 0x515   :  { %3182 = vadd.xlane.f32.xlu1 %v3169_v23 }
 0x517   :  { %3184 = vadd.xlane.f32.xlu0 %v3170_v28 }
 0x519   :  { %3186 = vadd.xlane.f32.xlu1 %v3171_v29 }
 0x598   :  { %v3173_v30 = vpop.xlane.xlu0 %3172 }
 0x599   :  { %v3201_v36 = vrot.slane %v3173_v30, %v5609_v31 }
 0x59a   :  { %v3177_v34 = vpop.xlane.xlu1 %3176 }
 0x59b   :  { %v3209_v38 = vrot.slane %v3177_v34, %v5609_v31 }
 0x59c   :  { %v3175_v35 = vpop.xlane.xlu0 %3174 }
 0x59d   :  { %v3205_v37 = vrot.slane %v3175_v35, %v5609_v31 }
 0x59e   :  { %v3179_v39 = vpop.xlane.xlu1 %3178 }
 0x59f   :  { %v3230_v40 = vsel %vm280_vm0, %v3205_v37, %v3201_v36  ;;  %v3213_v41 = vrot.slane %v3179_v39, %v5609_v31 }
 0x5a0   :  { %v3231_v42 = vsel %vm282_vm1, %v3209_v38, %v3230_v40  ;;  %v3181_v5 = vpop.xlane.xlu0 %3180 }
 0x5a1   :  { %v3232_v43 = vsel %vm284_vm2, %v3213_v41, %v3231_v42  ;;  %v3217_v6 = vrot.slane %v3181_v5, %v5609_v31 }
 0x5a2   :  { %v3183_v44 = vpop.xlane.xlu1 %3182 }
 0x5a3   :  { %v3233_v46 = vsel %vm286_vm3, %v3217_v6, %v3232_v43  ;;  %v3221_v47 = vrot.slane %v3183_v44, %v5609_v31 }
 0x5a4   :  { %v3185_v48 = vpop.xlane.xlu0 %3184 }
 0x5a5   :  { %v3225_v49 = vrot.slane %v3185_v48, %v5609_v31  ;;  %v3234_v50 = vsel %vm288_vm4, %v3221_v47, %v3233_v46 }
 0x5a6   :  { %v3187_v19 = vpop.xlane.xlu1 %3186 }
 0x5a7   :  { %v3229_v59 = vrot.slane %v3187_v19, %v5609_v31  ;;  %v3235_v52 = vsel %vm290_vm5, %v3225_v49, %v3234_v50 }
 0x5a9   :  { %v3236_v53 = vsel %vm292_vm6, %v3229_v59, %v3235_v52 }
 0x5aa   :  { %v3239_v54 = vsel %vm3238_vm8, %v3236_v53, -inf }
 0x5ab   :  { %3240 = vmax.xlane.f32.xlu0 %v3239_v54 }
 0x638   :  { %v3241_v60 = vpop.xlane.xlu0 %3240 }
 0x639   :  { %v3246_v10 = vrot.slane %v3241_v60, %v5465_v21  ;;  %v3250_v12 = vrot.slane %v3241_v60, %v5494_v18  ;;  %v3254_v58 = vrot.slane %v3241_v60, %v5506_v51  ;;  %v3258_v17 = vrot.slane %v3241_v60, %v5501_v27 }
 0x63a   :  { %v3262_v15 = vrot.slane %v3241_v60, %v5517_v25  ;;  %v3266_v16 = vrot.slane %v3241_v60, %v5520_v26  ;;  %v3270_v23 = vrot.slane %v3241_v60, %v5532_v45 }
 0x63b   :  { %v3283_v1 = vsub.f32 %v3173_v30, %v3246_v10  ;;  %v3284_v13 = vsub.f32 %v3175_v35, %v3250_v12  ;;  %v3285_v14 = vsub.f32 %v3177_v34, %v3254_v58  ;;  %v3286_v4 = vsub.f32 %v3179_v39, %v3258_v17 }
 0x63c   :  { %v3287_v20 = vsub.f32 %v3181_v5, %v3262_v15  ;;  %v3288_v24 = vsub.f32 %v3183_v44, %v3266_v16  ;;  %v3274_v30 = vrot.slane %v3241_v60, %v5527_v32  ;;  %v3289_v34 = vsub.f32 %v3185_v48, %v3270_v23 }
 0x63d   :  { %v3291_v61 = vmul.f32 1.442695, %v3283_v1  ;;  %v3293_v62 = vmul.f32 1.442695, %v3284_v13  ;;  %v3295_v11 = vmul.f32 1.442695, %v3285_v14 }
 0x63e   :  { %v3297_v22 = vmul.f32 1.442695, %v3286_v4  ;;  %v3299_v28 = vmul.f32 1.442695, %v3287_v20  ;;  %v3301_v35 = vmul.f32 1.442695, %v3288_v24  ;;  %v3290_v37 = vsub.f32 %v3187_v19, %v3274_v30 }
 0x63f   :  { %4972 = vpow2.f32 %v3291_v61  ;;  %v3303_v38 = vmul.f32 1.442695, %v3289_v34 }
 0x640   :  { %4974 = vpow2.f32 %v3293_v62  ;;  %v3305_v40 = vmul.f32 1.442695, %v3290_v37 }
 0x641   :  { %4976 = vpow2.f32 %v3295_v11  ;;  %v3511_v11 = vsel %vm3453_vm9, %v5548_v56, 0 }
 0x642   :  { %4978 = vpow2.f32 %v3297_v22  ;;  %4598 = vmatpush3.bf16.msra.mxu1 %v3511_v11  ;;  %v3847_v11 = vsel %vm3453_vm9, %v5573_v9, 0  ;;  %v4888_v9 = vld [vmem:[#allocation14 + $0x40] sm:$0xff]  }
 0x643   :  { %4980 = vpow2.f32 %v3299_v28  ;;  %4603 = vmatprep.subr.bf16.mxu1 %v5227_v33 }
 0x644   :  { %4982 = vpow2.f32 %v3301_v35 }
 0x645   :  { %4984 = vpow2.f32 %v3303_v38 }
 0x646   :  { %4986 = vpow2.f32 %v3305_v40 }
 0x649   :  { %v4973_v29 = vpop.eup %4972 }
 0x64a   :  { %v4975_v0 = vpop.eup %4974  ;;  %3316 = vperm.xlu1 %4696, %v4973_v29  }
 0x64b   :  { %3319 = vperm.xlu0 %4697, %v4975_v0   ;;  %v4977_v36 = vpop.eup %4976 }
 0x64c   :  { %v4979_v39 = vpop.eup %4978 }
 0x64d   :  { %v4981_v41 = vpop.eup %4980 }
 0x64e   :  { %3322 = vperm.xlu1 %4696, %v4977_v36   ;;  %v5635_v42 = vpop.eup %4982 }
 0x64f   :  { %v5638_v5 = vpop.eup %4984 }
 0x650   :  { %v5641_v43 = vpop.eup %4986 }
 0x652   :  { %3325 = vperm.xlu1 %4696, %v4979_v39  }
 0x656   :  { %3328 = vperm.xlu1 %4696, %v4981_v41  }
 0x65a   :  { %3331 = vperm.xlu1 %4696, %v5635_v42  }
 0x65e   :  { %3334 = vperm.xlu1 %4696, %v5638_v5  }
 0x662   :  { %3337 = vperm.xlu1 %4696, %v5641_v43  }
 0x6c9   :  { %v3317_v6 = vpop.permute.xlu1 %3316 }
 0x6ca   :  { %v3320_v48 = vpop.permute.xlu0 %3319  ;;  %v3342_v19 = vrot.slane %v3317_v6, %v5609_v31 }
 0x6cb   :  { %v3346_v50 = vrot.slane %v3320_v48, %v5609_v31 }
 0x6cd   :  { %v3323_v44 = vpop.permute.xlu1 %3322  ;;  %v3371_v60 = vsel %vm280_vm0, %v3346_v50, %v3342_v19 }
 0x6ce   :  { %v3350_v59 = vrot.slane %v3323_v44, %v5609_v31 }
 0x6d0   :  { %v3372_v12 = vsel %vm282_vm1, %v3350_v59, %v3371_v60  ;;  %v3623_v60 = vsel %vm3453_vm9, %v5560_v63, 0 }
 0x6d1   :  { %v3326_v46 = vpop.permute.xlu1 %3325 }
 0x6d2   :  { %v3354_v52 = vrot.slane %v3326_v46, %v5609_v31 }
 0x6d4   :  { %v3373_v17 = vsel %vm284_vm2, %v3354_v52, %v3372_v12 }
 0x6d5   :  { %v3329_v47 = vpop.permute.xlu1 %3328 }
 0x6d6   :  { %v3358_v53 = vrot.slane %v3329_v47, %v5609_v31 }
 0x6d8   :  { %v3374_v1 = vsel %vm286_vm3, %v3358_v53, %v3373_v17 }
 0x6d9   :  { %v3332_v49 = vpop.permute.xlu1 %3331 }
 0x6da   :  { %v3362_v10 = vrot.slane %v3332_v49, %v5609_v31 }
 0x6dc   :  { %v3375_v14 = vsel %vm288_vm4, %v3362_v10, %v3374_v1 }
 0x6dd   :  { %v3335_v54 = vpop.permute.xlu1 %3334 }
 0x6de   :  { %v3366_v58 = vrot.slane %v3335_v54, %v5609_v31 }
 0x6e0   :  { %v3376_v62 = vsel %vm290_vm5, %v3366_v58, %v3375_v14  ;;  %v3679_v58 = vsel %vm3453_vm9, %v5564_v2, 0 }
 0x6e1   :  { %v3338_v13 = vpop.permute.xlu1 %3337 }
 0x6e2   :  { %v3370_v61 = vrot.slane %v3338_v13, %v5609_v31  ;;  %v3735_v13 = vsel %vm3453_vm9, %v5566_v3, 0 }
 0x6e4   :  { %v3377_v15 = vsel %vm292_vm6, %v3370_v61, %v3376_v62  ;;  %v3791_v62 = vsel %vm3453_vm9, %v5571_v8, 0 }
 0x6e5   :  { %v3379_v4 = vsel %vm3238_vm8, %v3377_v15, 0.0 }
 0x6e6   :  { %3380 = vadd.xlane.f32.xlu1 %v3379_v4 }
 0x773   :  { %v3381_v16 = vpop.xlane.xlu1 %3380 }
 0x774   :  { %4988 = vrcp.f32 %v3381_v16 }
 0x77e   :  { %v4989_v20 = vpop.eup %4988 }
 0x77f   :  { %v3391_v22 = vrot.slane %v4989_v20, %v5494_v18  ;;  %v3387_v23 = vrot.slane %v4989_v20, %v5465_v21  ;;  %v3395_v30 = vrot.slane %v4989_v20, %v5506_v51  ;;  %v3399_v56 = vrot.slane %v4989_v20, %v5501_v27 }
 0x780   :  { %v3403_v40 = vrot.slane %v4989_v20, %v5517_v25  ;;  %v3455_v18 = vsel %vm3453_vm9, %v5546_v55, 0  ;;  %v3411_v47 = vrot.slane %v4989_v20, %v5532_v45  ;;  %v3415_v49 = vrot.slane %v4989_v20, %v5527_v32 }
 0x781   :  { %v3425_v24 = vmul.f32 %v4975_v0, %v3391_v22  ;;  %v3424_v28 = vmul.f32 %v4973_v29, %v3387_v23  ;;  %v3426_v38 = vmul.f32 %v4977_v36, %v3395_v30  ;;  %v3427_v46 = vmul.f32 %v4979_v39, %v3399_v56  ;;  %4592 = vmatpush3.bf16.msra.mxu0 %v3455_v18  ;;  %v4890_v30 = vld [vmem:[#allocation14 + $0x48] sm:$0xff]   ;;  %v4903_v18 = vld [vmem:[#allocation14 + $0x38] sm:$0xff]  }
 0x782   :  { %4609 = vmatprep.subr.bf16.mxu0 %v5227_v33  ;;  %v3428_v29 = vmul.f32 %v4981_v41, %v3403_v40  ;;  %v3407_v0 = vrot.slane %v4989_v20, %v5520_v26  ;;  %v3430_v55 = vmul.f32 %v5638_v5, %v3411_v47  ;;  %v3431_v41 = vmul.f32 %v5641_v43, %v3415_v49  ;;  %v4898_v56 = vld [vmem:[#allocation14 + $0x68] sm:$0xff]  }
 0x783   :  { %v3433_v34 = vpack.c.bf16 %v3425_v24, %v3425_v24  ;;  %v3432_v37 = vpack.c.bf16 %v3424_v28, %v3424_v28  ;;  %v3434_v44 = vpack.c.bf16 %v3426_v38, %v3426_v38  ;;  %v3435_v51 = vpack.c.bf16 %v3427_v46, %v3427_v46  ;;  %v4889_v28 = vld [vmem:[#allocation14] sm:$0xff]   ;;  %v4899_v40 = vld [vmem:[#allocation14 + $0x28] sm:$0xff]   ;;  %v4902_v46 = vld [vmem:[#allocation14 + $0x78] sm:$0xff]  }
 0x784   :  { %v3436_v36 = vpack.c.bf16 %v3428_v29, %v3428_v29  ;;  %v3429_v25 = vmul.f32 %v5635_v42, %v3407_v0  ;;  %v3438_v19 = vpack.c.bf16 %v3430_v55, %v3430_v55  ;;  %v3439_v59 = vpack.c.bf16 %v3431_v41, %v3431_v41  ;;  %v4897_v38 = vld [vmem:[#allocation14 + $0x20] sm:$0xff]  }
 0x785   :  { %v3498_v35 = vunpack.c.l.b16 %v3433_v34  ;;  %v3441_v6 = vunpack.c.l.b16 %v3432_v37  ;;  %v3554_v21 = vunpack.c.l.b16 %v3434_v44  ;;  %v3610_v27 = vunpack.c.l.b16 %v3435_v51  ;;  %v4891_v34 = vld [vmem:[#allocation14 + $0x8] sm:$0xff]   ;;  %v4895_v37 = vld [vmem:[#allocation14 + $0x18] sm:$0xff]   ;;  %v4901_v44 = vld [vmem:[#allocation14 + $0x30] sm:$0xff]  }
 0x786   :  { %v3666_v39 = vunpack.c.l.b16 %v3436_v36  ;;  %v3437_v48 = vpack.c.bf16 %v3429_v25, %v3429_v25  ;;  %v3778_v26 = vunpack.c.l.b16 %v3438_v19  ;;  %v3834_v52 = vunpack.c.l.b16 %v3439_v59 }
 0x787   :  { %3500 = vperm.xlu0 %4697, %v3498_v35   ;;  %v3567_v5 = vsel %vm3453_vm9, %v5558_v7, 0  ;;  %v4893_v35 = vld [vmem:[#allocation14 + $0x10] sm:$0xff]  }
 0x788   :  { %v3722_v50 = vunpack.c.l.b16 %v3437_v48 }
 0x78b   :  { %3443 = vperm.xlu0 %4697, %v3441_v6   ;;  %v4900_v6 = vld [vmem:[#allocation14 + $0x70] sm:$0xff]  }
 0x78f   :  { %3556 = vperm.xlu0 %4697, %v3554_v21  }
 0x793   :  { %3612 = vperm.xlu0 %4697, %v3610_v27  }
 0x797   :  { %3668 = vperm.xlu0 %4697, %v3666_v39  }
 0x79b   :  { %3724 = vperm.xlu0 %4697, %v3722_v50  }
 0x79f   :  { %3780 = vperm.xlu0 %4697, %v3778_v26  }
 0x7a3   :  { %3836 = vperm.xlu0 %4697, %v3834_v52  }
 0x806   :  { %v3501_v42 = vpop.permute.xlu0 %3500 }
 0x807   :  { %v3505_v45 = vrot.slane %v3501_v42, %v5609_v31 }
 0x809   :  { %v3506_v53 = vpack.c.b16 %v3505_v45, %v3505_v45 }
 0x80a   :  { %v3444_v54 = vpop.permute.xlu0 %3443 }
 0x80b   :  { %v3448_v32 = vrot.slane %v3444_v54, %v5609_v31  ;;  %4600 = vmatmul.mubr.msk.bf16.vlgmr.msra.gmra.mrb[20].mxu1 %vm3238_vm8, %v3506_v53 }
 0x80c   :  { %4604 = vmatpush3.bf16.msra.mxu1 %v3567_v5  ;;  %4605 = vmatprep.mubr.msk.bf16.mxu1 %vm5228_vm7, %v5227_v33 }
 0x80d   :  { %v3449_v43 = vpack.c.b16 %v3448_v32, %v3448_v32  ;;  %4615 = vmatprep.subr.bf16.mxu1 %v5227_v33 }
 0x80e   :  { %v3557_v10 = vpop.permute.xlu0 %3556 }
 0x80f   :  { %v3561_v12 = vrot.slane %v3557_v10, %v5609_v31  ;;  %4594 = vmatmul.mubr.msk.bf16.vlgmr.msra.gmra.mrb[20].mxu0 %vm3238_vm8, %v3449_v43 }
 0x810   :  { %4610 = vmatpush3.bf16.msra.mxu0 %v3623_v60  ;;  %4611 = vmatprep.mubr.msk.bf16.mxu0 %vm5228_vm7, %v5227_v33 }
 0x811   :  { %v3562_v7 = vpack.c.b16 %v3561_v12, %v3561_v12  ;;  %4621 = vmatprep.subr.bf16.mxu0 %v5227_v33 }
 0x812   :  { %v3613_v17 = vpop.permute.xlu0 %3612 }
 0x813   :  { %v3617_v63 = vrot.slane %v3613_v17, %v5609_v31  ;;  %4606 = vmatmul.mubr.msk.bf16.vlgmr.msra.gmra.mrb[24].mxu1 %vm3238_vm8, %v3562_v7 }
 0x814   :  { %4616 = vmatpush3.bf16.msra.mxu1 %v3679_v58  ;;  %4617 = vmatprep.mubr.msk.bf16.mxu1 %vm5228_vm7, %v5227_v33 }
 0x815   :  { %v3618_v1 = vpack.c.b16 %v3617_v63, %v3617_v63  ;;  %4627 = vmatprep.subr.bf16.mxu1 %v5227_v33 }
 0x816   :  { %v3669_v14 = vpop.permute.xlu0 %3668 }
 0x817   :  { %v3673_v2 = vrot.slane %v3669_v14, %v5609_v31  ;;  %4612 = vmatmul.mubr.msk.bf16.vlgmr.msra.gmra.mrb[24].mxu0 %vm3238_vm8, %v3618_v1 }
 0x818   :  { %4622 = vmatpush3.bf16.msra.mxu0 %v3735_v13  ;;  %4623 = vmatprep.mubr.msk.bf16.mxu0 %vm5228_vm7, %v5227_v33 }
 0x819   :  { %v3674_v61 = vpack.c.b16 %v3673_v2, %v3673_v2  ;;  %4633 = vmatprep.subr.bf16.mxu0 %v5227_v33 }
 0x81a   :  { %v3725_v15 = vpop.permute.xlu0 %3724 }
 0x81b   :  { %v3729_v3 = vrot.slane %v3725_v15, %v5609_v31  ;;  %4618 = vmatmul.mubr.msk.bf16.vlgmr.msra.gmra.mrb[28].mxu1 %vm3238_vm8, %v3674_v61 }
 0x81c   :  { %4628 = vmatpush3.bf16.msra.mxu1 %v3791_v62  ;;  %4629 = vmatprep.mubr.msk.bf16.mxu1 %vm5228_vm7, %v5227_v33 }
 0x81d   :  { %v3730_v4 = vpack.c.b16 %v3729_v3, %v3729_v3  ;;  %4525 = vmatprep.subr.bf16.mxu1 %v4888_v9 }
 0x81e   :  { %v3781_v16 = vpop.permute.xlu0 %3780 }
 0x81f   :  { %v3785_v20 = vrot.slane %v3781_v16, %v5609_v31  ;;  %4624 = vmatmul.mubr.msk.bf16.vlgmr.msra.gmra.mrb[28].mxu0 %vm3238_vm8, %v3730_v4 }
 0x820   :  { %4634 = vmatpush3.bf16.msra.mxu0 %v3847_v11  ;;  %4635 = vmatprep.mubr.msk.bf16.mxu0 %vm5228_vm7, %v5227_v33  ;;  %v4892_v33 = vld [vmem:[#allocation14 + $0x50] sm:$0xff]  }
 0x821   :  { %v3786_v8 = vpack.c.b16 %v3785_v20, %v3785_v20 }
 0x822   :  { %v3837_v22 = vpop.permute.xlu0 %3836 }
 0x823   :  { %v3841_v23 = vrot.slane %v3837_v22, %v5609_v31  ;;  %4630 = vmatmul.mubr.msk.bf16.vlgmr.msra.gmra.mrb[32].mxu1 %vm3238_vm8, %v3786_v8  ;;  %v4894_v31 = vld [vmem:[#allocation14 + $0x58] sm:$0xff]  }
 0x824   :  { %4096 = vmatprep.mubr.bf16.mxu1 %v5587_v57  ;;  %4526 = vmatpush3.bf16.msra.mxu1 %v4889_v28  ;;  %v4896_v57 = vld [vmem:[#allocation14 + $0x60] sm:$0xff]  }
 0x825   :  { %v3842_v24 = vpack.c.b16 %v3841_v23, %v3841_v23  ;;  %4527 = vmatprep.subr.bf16.mxu1 %v4890_v30 }
 0x827   :  { %4636 = vmatmul.mubr.msk.bf16.vlgmr.msra.gmra.mrb[32].mxu0 %vm3238_vm8, %v3842_v24 }
 0x828   :  { %4528 = vmatpush3.bf16.msra.mxu1 %v4891_v34 }
 0x829   :  { %4529 = vmatprep.subr.bf16.mxu1 %v4892_v33 }
 0x82c   :  { %4530 = vmatpush3.bf16.msra.mxu1 %v4893_v35 }
 0x82d   :  { %4531 = vmatprep.subr.bf16.mxu1 %v4894_v31 }
 0x830   :  { %4532 = vmatpush3.bf16.msra.mxu1 %v4895_v37 }
 0x831   :  { %4533 = vmatprep.subr.bf16.mxu1 %v4896_v57 }
 0x834   :  { %4534 = vmatpush3.bf16.msra.mxu1 %v4897_v38 }
 0x835   :  { %4535 = vmatprep.subr.bf16.mxu1 %v4898_v56 }
 0x838   :  { %4536 = vmatpush3.bf16.msra.mxu1 %v4899_v40 }
 0x839   :  { %4537 = vmatprep.subr.bf16.mxu1 %v4900_v6 }
 0x83c   :  { %4538 = vmatpush3.bf16.msra.mxu1 %v4901_v44 }
 0x83d   :  { %4539 = vmatprep.subr.bf16.mxu1 %v4902_v46 }
 0x840   :  { %4540 = vmatpush3.bf16.msra.mxu1 %v4903_v18 }
 0x8de   :  { %v3547_v21 = vpop.f32.mrb[20].mxu1 }
 0x8df   :  { %v3890_v51 = vpack.c.bf16 %v3547_v21, %v3547_v21  ;;  %v4601_v29 = vpop.f32.mrb[21].mxu1  ;;  %v4471_v21 = vld [vmem:[%s5757_s13] ss:$0 sm:$0xff] }
 0x8e0   :  { %v3550_v0 = vpop.f32.mrb[22].mxu1 }
 0x8e1   :  { %v3906_v27 = vunpack.c.l.b16 %v3890_v51  ;;  %v4602_v36 = vpop.f32.mrb[23].mxu1 }
 0x8e2   :  { %v3491_v25 = vpop.f32.mrb[20].mxu0 }
 0x8e3   :  { %v3889_v47 = vpack.c.bf16 %v3491_v25, %v3491_v25  ;;  %v4595_v39 = vpop.f32.mrb[21].mxu0  ;;  %v3913_v55 = vrot.slane %v3906_v27, 7 }
 0x8e4   :  { %v3494_v48 = vpop.f32.mrb[22].mxu0 }
 0x8e5   :  { %v3905_v49 = vunpack.c.l.b16 %v3889_v47  ;;  %v4596_v50 = vpop.f32.mrb[23].mxu0 }
 0x8e6   :  { %v3603_v19 = vpop.f32.mrb[24].mxu1 }
 0x8e7   :  { %v3914_v41 = vsel %vm280_vm0, %v3913_v55, %v3905_v49  ;;  %v3891_v26 = vpack.c.bf16 %v3603_v19, %v3603_v19  ;;  %v4607_v59 = vpop.f32.mrb[25].mxu1 }
 0x8e8   :  { %v3606_v52 = vpop.f32.mrb[26].mxu1 }
 0x8e9   :  { %v3907_v42 = vunpack.c.l.b16 %v3891_v26  ;;  %v4608_v45 = vpop.f32.mrb[27].mxu1 }
 0x8ea   :  { %v3659_v53 = vpop.f32.mrb[24].mxu0 }
 0x8eb   :  { %v3915_v5 = vrot.slane %v3907_v42, 6  ;;  %v3892_v54 = vpack.c.bf16 %v3659_v53, %v3659_v53  ;;  %v4613_v32 = vpop.f32.mrb[25].mxu0 }
 0x8ec   :  { %v3662_v43 = vpop.f32.mrb[26].mxu0 }
 0x8ed   :  { %v3916_v60 = vsel %vm282_vm1, %v3915_v5, %v3914_v41  ;;  %v3908_v10 = vunpack.c.l.b16 %v3892_v54  ;;  %v4614_v12 = vpop.f32.mrb[27].mxu0 }
 0x8ee   :  { %v3715_v7 = vpop.f32.mrb[28].mxu1 }
 0x8ef   :  { %v3917_v58 = vrot.slane %v3908_v10, 5  ;;  %v3893_v17 = vpack.c.bf16 %v3715_v7, %v3715_v7  ;;  %v4619_v63 = vpop.f32.mrb[29].mxu1 }
 0x8f0   :  { %v3718_v1 = vpop.f32.mrb[30].mxu1 }
 0x8f1   :  { %v3918_v13 = vsel %vm284_vm2, %v3917_v58, %v3916_v60  ;;  %v3909_v14 = vunpack.c.l.b16 %v3893_v17  ;;  %v4620_v2 = vpop.f32.mrb[31].mxu1 }
 0x8f2   :  { %v3771_v61 = vpop.f32.mrb[28].mxu0 }
 0x8f3   :  { %v3919_v62 = vrot.slane %v3909_v14, 4  ;;  %v3894_v15 = vpack.c.bf16 %v3771_v61, %v3771_v61  ;;  %v4625_v3 = vpop.f32.mrb[29].mxu0 }
 0x8f4   :  { %v3774_v4 = vpop.f32.mrb[30].mxu0 }
 0x8f5   :  { %v3920_v11 = vsel %vm286_vm3, %v3919_v62, %v3918_v13  ;;  %v3910_v16 = vunpack.c.l.b16 %v3894_v15  ;;  %v4626_v20 = vpop.f32.mrb[31].mxu0 }
 0x8f6   :  { %v3827_v8 = vpop.f32.mrb[32].mxu1 }
 0x8f7   :  { %v3921_v22 = vrot.slane %v3910_v16, 3  ;;  %v3895_v23 = vpack.c.bf16 %v3827_v8, %v3827_v8  ;;  %v4631_v24 = vpop.f32.mrb[33].mxu1 }
 0x8f8   :  { %v3830_v9 = vpop.f32.mrb[34].mxu1 }
 0x8f9   :  { %v3922_v28 = vsel %vm288_vm4, %v3921_v22, %v3920_v11  ;;  %v3911_v30 = vunpack.c.l.b16 %v3895_v23  ;;  %v4632_v34 = vpop.f32.mrb[35].mxu1 }
 0x8fa   :  { %v3883_v33 = vpop.f32.mrb[32].mxu0 }
 0x8fb   :  { %v3923_v35 = vrot.slane %v3911_v30, 2  ;;  %v3896_v31 = vpack.c.bf16 %v3883_v33, %v3883_v33  ;;  %v4637_v37 = vpop.f32.mrb[33].mxu0 }
 0x8fc   :  { %v3886_v57 = vpop.f32.mrb[34].mxu0 }
 0x8fd   :  { %v3924_v38 = vsel %vm290_vm5, %v3923_v35, %v3922_v28  ;;  %v3912_v56 = vunpack.c.l.b16 %v3896_v31  ;;  %v4638_v40 = vpop.f32.mrb[35].mxu0 }
 0x8ff   :  { %v3925_v6 = vrot.slane %v3912_v56, 1 }
 0x901   :  { %v3926_v44 = vsel %vm292_vm6, %v3925_v6, %v3924_v38 }
 0x902   :  { %v3927_v46 = vpack.c.b16 %v3926_v44, %v3926_v44 }
 0x904   :  { %4097 = vmatmul.mubr.bf16.vlgmr.msra.gmra.mrb[36].mxu1 %v3927_v46 }
 0x9d7   :  { %v4541_v18 = vpop.f32.mrb[36].mxu1 }
 0x9d8   :  { %v4542_v51 = vpop.f32.mrb[37].mxu1 }
 0x9d9   :  { %v4543_v29 = vadd.f32 %v4542_v51, %v4541_v18  ;;  %v4544_v0 = vpop.f32.mrb[38].mxu1 }
 0x9da   :  { %v4545_v27 = vpop.f32.mrb[39].mxu1 }
 0x9db   :  { %v4099_v36 = vadd.f32 %v4543_v29, %v4471_v21 }
 0x9dd   :  { %4990 = vtanh.f32 %v4099_v36 }
 0x9e7   :  { %v4991_v25 = vpop.eup %4990 }
 0x9e8   :  { %v4105_v47 = vpack.c.bf16 %v4991_v25, %v4991_v25 }
 0x9ea   :  { %4106 = vst [vmem:[#allocation16] sm:$0xf] %v4105_v47 }
 0x9eb   :  { %5187 = shalt.err (!%p5184_p12)
}
 0x9ec   :  { %s5188_s6 = scalar_lea.hbm %s5758_s14, 64 }
 0x9ed   :  { %p5189_p13 = scmp.ne.s32.totalorder %s5758_s14, %s5188_s6  ;;  %p5192_p0 = scmp.lt.u32.totalorder %s5188_s6, %s5758_s14 }
 0x9ef   :  { %p5194_p1 = pnand %p5192_p0, %p5189_p13 }
 0x9f1   :  { %5197 = shalt.err (!%p5194_p1)
}
 0x9f2   :  { %4116 = dma.vmem_to_hbm [thread:$0]  %s4114_s17, 64, %s5758_s14, [#allocation4]  }
 0x9f3   :  { %5208 = dma.done.wait [#allocation4], 64  }
 0x9f4   :  { %5209 = vsyncadd [#allocation4], 4294967232 }
 0x9f5   :  { %4120 = vsyncpa [#allocation3], 1 }
 0x9f6   :  { %4121 = vsyncpa [#allocation6], 1 }
 0x9f7   :  { %4122 = vsyncpa [#allocation9], 1 }
 0x9f8   :  { %4123 = vsyncpa [#allocation12], 1 }
 0x9f9   :  { %4124 = vsyncpa [#allocation15], 1 }
 0x9fa   :  { %4125 = vsyncpa [#allocation4], 1 }

</bundles_post_ra>
